<compile_context>
chip_gen: v5e
topology: v5e:2x2
jax: 0.10.0
libtpu: 0.0.40
codegen_flags: <defaults>
</compile_context>

<pallas_src>
import functools

import jax
import jax.numpy as jnp
from jax.experimental import pallas as pl
from jax.experimental.pallas import tpu as pltpu


def _layernorm(x, g, b, eps=1e-6):
    mu = jnp.mean(x, axis=-1, keepdims=True)
    var = jnp.mean((x - mu) ** 2, axis=-1, keepdims=True)
    return (x - mu) * jax.lax.rsqrt(var + eps) * g + b


def transformer2d_kernel(
    q_ref, k_ref, pemb_ref, pk_ref,
    wq, wk, wv,
    wa1, ba1, wa2,
    wo,
    wf1, bf1, wf2,
    out_ref,
    *, approx_recip,
):
    """One block of TR rays.

    q_ref:    (TR, D)      f32
    k_ref:    (V, TR, D)   matmul dtype
    pemb_ref: (V, TR, D)   matmul dtype (precomputed positional embedding)
    pk_ref:   (8, D)       f32 packed [ln1_g, ln1_b, ln2_g, ln2_b, ba2, bo, bf2, 0]
    out_ref:  (TR, D)      f32
    """
    f32 = jnp.float32
    V = k_ref.shape[0]
    md = wq.dtype  # matmul operand dtype (bf16 in perf mode, f32 in strict mode)

    q = q_ref[...]                       # (TR, D) f32
    pk = pk_ref[...]                     # (8, D)
    ln1_g, ln1_b = pk[0:1], pk[1:2]
    ln2_g, ln2_b = pk[2:3], pk[3:4]
    ba2, bo, bf2 = pk[4:5], pk[5:6], pk[6:7]

    residue = q

    # --- attn_norm (LayerNorm, eps=1e-6) ---
    x = _layernorm(q, ln1_g, ln1_b)

    # --- Attention2D ---
    qp = jnp.dot(x.astype(md), wq[...], preferred_element_type=f32)      # (TR, D)

    wk_v, wv_v = wk[...], wv[...]
    wa1_v, wa2_v, ba1_v = wa1[...], wa2[...], ba1[...]

    attn_logits = []
    v_plus_pos = []
    for v in range(V):  # V is tiny (4) and static: unrolled at trace time.
        kp = jnp.dot(k_ref[v], wk_v, preferred_element_type=f32)         # (TR, D)
        # NOTE: PyTorch applies v_fc to the *already projected* k.
        vp = jnp.dot(kp.astype(md), wv_v, preferred_element_type=f32)    # (TR, D)
        pe = pemb_ref[v].astype(f32)                                     # (TR, D)

        a = kp - qp + pe
        ah = jnp.maximum(
            jnp.dot(a.astype(md), wa1_v, preferred_element_type=f32) + ba1_v, 0.0)
        a = jnp.dot(ah.astype(md), wa2_v, preferred_element_type=f32) + ba2
        # TODO(synk): masked_fill(mask == 0, -1e9) path omitted -- forward uses mask=None.
        attn_logits.append(a)
        v_plus_pos.append(vp + pe)

    # softmax over the view axis (torch dim=-2): combine the V slabs elementwise.
    m = attn_logits[0]
    for a in attn_logits[1:]:
        m = jnp.maximum(m, a)
    exps = [jnp.exp(a - m) for a in attn_logits]
    denom = exps[0]
    for e in exps[1:]:
        denom = denom + e
    if approx_recip:
        inv = pl.reciprocal(denom, approx=True)   # EUP slot
    else:
        inv = 1.0 / denom

    xa = exps[0] * v_plus_pos[0]
    for e, vpe in zip(exps[1:], v_plus_pos[1:]):
        xa = xa + e * vpe
    xa = xa * inv                                                        # (TR, D)

    x = jnp.dot(xa.astype(md), wo[...], preferred_element_type=f32) + bo
    x = x + residue

    # --- FeedForward ---
    residue = x
    xn = _layernorm(x, ln2_g, ln2_b)
    h = jnp.maximum(
        jnp.dot(xn.astype(md), wf1[...], preferred_element_type=f32) + bf1[...], 0.0)
    xf = jnp.dot(h.astype(md), wf2[...], preferred_element_type=f32) + bf2
    # TODO(synk): exercute_aliasing_filter (aliasing_filter=True branch) is not defined
    # in the provided source; only the default aliasing_filter=False path is implemented.
    out_ref[...] = (xf + residue).astype(out_ref.dtype)


def _round_up(x, m):
    return ((x + m - 1) // m) * m


def _pad_axis(x, size, axis):
    pad = size - x.shape[axis]
    if pad <= 0:
        return x
    widths = [(0, 0)] * x.ndim
    widths[axis] = (0, pad)
    return jnp.pad(x, widths)


def _const_spec(arr):
    nd = arr.ndim
    return pl.BlockSpec(arr.shape, lambda i, _nd=nd: (0,) * _nd)


def transformer2d_forward(q, k, pos, params, *,
                          matmul_dtype=jnp.bfloat16, block_rays=256):
    """q: (B, N, D), k: (B, N, V, D), pos: (B, N, V, 4) -> (B, N, D)."""
    B, N, D = q.shape
    V = k.shape[2]
    R = B * N
    f32 = jnp.float32

    # --- hoisted positional MLP (tiny K=4 / N=D//8 matmuls; bad MXU fit in-kernel) ---
    posf = pos.reshape(R, V, 4).astype(f32)
    ph = jnp.maximum(posf @ params["wp1"].astype(f32) + params["bp1"], 0.0)
    pemb = ph @ params["wp2"].astype(f32) + params["bp2"]                # (R, V, D)

    # --- ray blocking ---
    TR = min(block_rays, _round_up(R, 8))
    TR = _round_up(TR, 8)
    Rpad = _round_up(R, TR)
    num_blocks = Rpad // TR

    qf = _pad_axis(q.reshape(R, D).astype(f32), Rpad, axis=0)                  # (Rpad, D)
    kf = _pad_axis(jnp.transpose(k.reshape(R, V, D), (1, 0, 2)),
                   Rpad, axis=1).astype(matmul_dtype)                          # (V, Rpad, D)
    pembf = _pad_axis(jnp.transpose(pemb, (1, 0, 2)),
                      Rpad, axis=1).astype(matmul_dtype)                       # (V, Rpad, D)

    # Packed per-channel params: [ln1_g, ln1_b, ln2_g, ln2_b, ba2, bo, bf2, 0] -> (8, D)
    packed = jnp.stack(
        [params["ln1_g"], params["ln1_b"], params["ln2_g"], params["ln2_b"],
         params["ba2"], params["bo"], params["bf2"], jnp.zeros((D,), f32)],
        axis=0).astype(f32)

    w = lambda name: params[name].astype(matmul_dtype)
    weights = [
        packed,
        w("wq"), w("wk"), w("wv"),
        w("wa1"), params["ba1"].reshape(1, -1).astype(f32), w("wa2"),
        w("wo"),
        w("wf1"), params["bf1"].reshape(1, -1).astype(f32), w("wf2"),
    ]

    in_specs = [
        pl.BlockSpec((TR, D), lambda i: (i, 0)),
        pl.BlockSpec((V, TR, D), lambda i: (0, i, 0)),
        pl.BlockSpec((V, TR, D), lambda i: (0, i, 0)),
    ] + [_const_spec(a) for a in weights]

    use_approx = jnp.dtype(matmul_dtype) != jnp.dtype(jnp.float32)
    kernel = functools.partial(transformer2d_kernel, approx_recip=bool(use_approx))

    out = pl.pallas_call(
        kernel,
        out_shape=jax.ShapeDtypeStruct((Rpad, D), f32),
        grid=(num_blocks,),
        in_specs=in_specs,
        out_specs=pl.BlockSpec((TR, D), lambda i: (i, 0)),
        compiler_params=pltpu.CompilerParams(dimension_semantics=("parallel",)),
    )(qf, kf, pembf, *weights)

    return out[:R].reshape(B, N, D)


def init_params(key, dim, ff_hid_dim):
    d8 = dim // 8
    shapes = {
        "ln1_g": (dim,), "ln1_b": (dim,),
        "wq": (dim, dim), "wk": (dim, dim), "wv": (dim, dim),
        "wp1": (4, d8), "bp1": (d8,), "wp2": (d8, dim), "bp2": (dim,),
        "wa1": (dim, d8), "ba1": (d8,), "wa2": (d8, dim), "ba2": (dim,),
        "wo": (dim, dim), "bo": (dim,),
        "ln2_g": (dim,), "ln2_b": (dim,),
        "wf1": (dim, ff_hid_dim), "bf1": (ff_hid_dim,),
        "wf2": (ff_hid_dim, dim), "bf2": (dim,),
    }
    params = {}
    names = sorted(shapes)
    keys = jax.random.split(key, len(names))
    for kk, name in zip(keys, names):
        shp = shapes[name]
        if name.startswith("ln") and name.endswith("_g"):
            params[name] = (1.0 + 0.1 * jax.random.normal(kk, shp)).astype(jnp.float32)
        else:
            params[name] = (0.1 * jax.random.normal(kk, shp)).astype(jnp.float32)
    return params


def reference_forward(q, k, pos, p):
    # Pure-JAX reference mirroring the PyTorch forward (eval mode, mask=None).
    def ln(x, g, b):
        mu = x.mean(-1, keepdims=True)
        var = ((x - mu) ** 2).mean(-1, keepdims=True)
        return (x - mu) / jnp.sqrt(var + 1e-6) * g + b

    residue = q
    x = ln(q, p["ln1_g"], p["ln1_b"])
    qp = x @ p["wq"]
    kp = k @ p["wk"]
    vp = kp @ p["wv"]
    pemb = jnp.maximum(pos @ p["wp1"] + p["bp1"], 0.0) @ p["wp2"] + p["bp2"]
    attn = kp - qp[:, :, None, :] + pemb
    attn = jnp.maximum(attn @ p["wa1"] + p["ba1"], 0.0) @ p["wa2"] + p["ba2"]
    attn = jax.nn.softmax(attn, axis=-2)
    x = ((vp + pemb) * attn).sum(axis=2)
    x = x @ p["wo"] + p["bo"]
    x = x + residue
    residue = x
    xn = ln(x, p["ln2_g"], p["ln2_b"])
    xf = jnp.maximum(xn @ p["wf1"] + p["bf1"], 0.0) @ p["wf2"] + p["bf2"]
    return xf + residue


if __name__ == "__main__":
    B, N, V, D, H = 2, 8, 4, 64, 128   # dim=64, ff_hid_dim=128, dim//8=8
    key = jax.random.PRNGKey(0)
    kq, kk, kp_, kw = jax.random.split(key, 4)
    params = init_params(kw, D, H)

    # --- Test 1: strict numerical check (f32 matmuls, exact reciprocal) ---
    q = jax.random.normal(kq, (B, N, D), dtype=jnp.float32)
    k = jax.random.normal(kk, (B, N, V, D), dtype=jnp.float32)
    pos = jax.random.normal(kp_, (B, N, V, 4), dtype=jnp.float32)
    ref = reference_forward(q, k, pos, params)

    out = transformer2d_forward(q, k, pos, params, matmul_dtype=jnp.float32)
    out = jax.block_until_ready(out)
    assert out.shape == (B, N, D), out.shape
    err = float(jnp.max(jnp.abs(out - ref)))
    assert jnp.allclose(out, ref, rtol=1e-4, atol=1e-4), err

    # --- Test 2: perf configuration (default bf16 MXU operands, f32 accum),
    # multi-block grid with ray padding (R=140, TR=64 -> 3 blocks). ---
    B2, N2 = 2, 70
    q2 = jax.random.normal(kq, (B2, N2, D), dtype=jnp.float32)
    k2 = jax.random.normal(kk, (B2, N2, V, D), dtype=jnp.float32)
    pos2 = jax.random.normal(kp_, (B2, N2, V, 4), dtype=jnp.float32)
    ref2 = reference_forward(q2, k2, pos2, params)

    out2 = transformer2d_forward(q2, k2, pos2, params, block_rays=64)
    out2 = jax.block_until_ready(out2)
    assert out2.shape == (B2, N2, D), out2.shape
    err2 = float(jnp.max(jnp.abs(out2 - ref2)))
    # bf16 operands + approx reciprocal -> loose tolerance; f32 path above is strict.
    assert jnp.allclose(out2, ref2, rtol=5e-2, atol=2e-1), err2

    print("KERNEL_OK")
</pallas_src>

<mosaic_0001>
module attributes {stable_mosaic.version = 11 : i64} {
  func.func @transformer2d_kernel(%arg0: i32, %arg1: memref<16x64xf32, #tpu.memory_space<vmem>>, %arg2: memref<4x16x64xf32, #tpu.memory_space<vmem>>, %arg3: memref<4x16x64xf32, #tpu.memory_space<vmem>>, %arg4: memref<8x64xf32, #tpu.memory_space<vmem>>, %arg5: memref<64x64xf32, #tpu.memory_space<vmem>>, %arg6: memref<64x64xf32, #tpu.memory_space<vmem>>, %arg7: memref<64x64xf32, #tpu.memory_space<vmem>>, %arg8: memref<64x8xf32, #tpu.memory_space<vmem>>, %arg9: memref<1x8xf32, #tpu.memory_space<vmem>>, %arg10: memref<8x64xf32, #tpu.memory_space<vmem>>, %arg11: memref<64x64xf32, #tpu.memory_space<vmem>>, %arg12: memref<64x128xf32, #tpu.memory_space<vmem>>, %arg13: memref<1x128xf32, #tpu.memory_space<vmem>>, %arg14: memref<128x64xf32, #tpu.memory_space<vmem>>, %arg15: memref<16x64xf32, #tpu.memory_space<vmem>>) attributes {dimension_semantics = [#tpu.dimension_semantics<parallel>], iteration_bounds = array<i64: 1>, scalar_prefetch = 0 : i64, scratch_operands = 0 : i64, tpu.core_type = #tpu.core_type<tc>, window_params = [{transform_indices = @transform_0, window_bounds = array<i64: 16, 64>}, {transform_indices = @transform_1, window_bounds = array<i64: 4, 16, 64>}, {transform_indices = @transform_2, window_bounds = array<i64: 4, 16, 64>}, {pipeline_mode = #tpu.pipeline_mode<synchronous>, transform_indices = @transform_3, window_bounds = array<i64: 8, 64>}, {pipeline_mode = #tpu.pipeline_mode<synchronous>, transform_indices = @transform_4, window_bounds = array<i64: 64, 64>}, {pipeline_mode = #tpu.pipeline_mode<synchronous>, transform_indices = @transform_5, window_bounds = array<i64: 64, 64>}, {pipeline_mode = #tpu.pipeline_mode<synchronous>, transform_indices = @transform_6, window_bounds = array<i64: 64, 64>}, {pipeline_mode = #tpu.pipeline_mode<synchronous>, transform_indices = @transform_7, window_bounds = array<i64: 64, 8>}, {pipeline_mode = #tpu.pipeline_mode<synchronous>, transform_indices = @transform_8, window_bounds = array<i64: 1, 8>}, {pipeline_mode = #tpu.pipeline_mode<synchronous>, transform_indices = @transform_9, window_bounds = array<i64: 8, 64>}, {pipeline_mode = #tpu.pipeline_mode<synchronous>, transform_indices = @transform_10, window_bounds = array<i64: 64, 64>}, {pipeline_mode = #tpu.pipeline_mode<synchronous>, transform_indices = @transform_11, window_bounds = array<i64: 64, 128>}, {pipeline_mode = #tpu.pipeline_mode<synchronous>, transform_indices = @transform_12, window_bounds = array<i64: 1, 128>}, {pipeline_mode = #tpu.pipeline_mode<synchronous>, transform_indices = @transform_13, window_bounds = array<i64: 128, 64>}, {transform_indices = @transform_14, window_bounds = array<i64: 16, 64>}]} {
    %c0 = arith.constant 0 : index
    %c0_0 = arith.constant 0 : index
    %0 = vector.load %arg1[%c0, %c0_0] : memref<16x64xf32, #tpu.memory_space<vmem>>, vector<16x64xf32>
    %c0_1 = arith.constant 0 : index
    %c0_2 = arith.constant 0 : index
    %1 = vector.load %arg4[%c0_1, %c0_2] : memref<8x64xf32, #tpu.memory_space<vmem>>, vector<8x64xf32>
    %2 = vector.extract_strided_slice %1 {offsets = [0, 0], sizes = [1, 64], strides = [1, 1]} : vector<8x64xf32> to vector<1x64xf32>
    %3 = vector.extract_strided_slice %1 {offsets = [1, 0], sizes = [1, 64], strides = [1, 1]} : vector<8x64xf32> to vector<1x64xf32>
    %4 = vector.extract_strided_slice %1 {offsets = [2, 0], sizes = [1, 64], strides = [1, 1]} : vector<8x64xf32> to vector<1x64xf32>
    %5 = vector.extract_strided_slice %1 {offsets = [3, 0], sizes = [1, 64], strides = [1, 1]} : vector<8x64xf32> to vector<1x64xf32>
    %6 = vector.extract_strided_slice %1 {offsets = [4, 0], sizes = [1, 64], strides = [1, 1]} : vector<8x64xf32> to vector<1x64xf32>
    %7 = vector.extract_strided_slice %1 {offsets = [5, 0], sizes = [1, 64], strides = [1, 1]} : vector<8x64xf32> to vector<1x64xf32>
    %8 = vector.extract_strided_slice %1 {offsets = [6, 0], sizes = [1, 64], strides = [1, 1]} : vector<8x64xf32> to vector<1x64xf32>
    %cst = arith.constant dense<0.000000e+00> : vector<16xf32>
    %9 = vector.multi_reduction <add>, %0, %cst [1] : vector<16x64xf32> to vector<16xf32>
    %10 = vector.shape_cast %9 : vector<16xf32> to vector<16x1xf32>
    %cst_3 = arith.constant 6.400000e+01 : f32
    %11 = vector.broadcast %cst_3 : f32 to vector<16x1xf32>
    %12 = arith.divf %10, %11 : vector<16x1xf32>
    %13 = vector.broadcast %12 : vector<16x1xf32> to vector<16x64xf32>
    %14 = arith.subf %0, %13 : vector<16x64xf32>
    %15 = arith.mulf %14, %14 : vector<16x64xf32>
    %cst_4 = arith.constant dense<0.000000e+00> : vector<16xf32>
    %16 = vector.multi_reduction <add>, %15, %cst_4 [1] : vector<16x64xf32> to vector<16xf32>
    %17 = vector.shape_cast %16 : vector<16xf32> to vector<16x1xf32>
    %cst_5 = arith.constant 6.400000e+01 : f32
    %18 = vector.broadcast %cst_5 : f32 to vector<16x1xf32>
    %19 = arith.divf %17, %18 : vector<16x1xf32>
    %20 = vector.broadcast %12 : vector<16x1xf32> to vector<16x64xf32>
    %21 = arith.subf %0, %20 : vector<16x64xf32>
    %cst_6 = arith.constant 9.99999997E-7 : f32
    %22 = vector.broadcast %cst_6 : f32 to vector<16x1xf32>
    %23 = arith.addf %19, %22 : vector<16x1xf32>
    %24 = math.rsqrt %23 : vector<16x1xf32>
    %25 = vector.broadcast %24 : vector<16x1xf32> to vector<16x64xf32>
    %26 = arith.mulf %21, %25 : vector<16x64xf32>
    %27 = vector.broadcast %2 : vector<1x64xf32> to vector<16x64xf32>
    %28 = arith.mulf %26, %27 : vector<16x64xf32>
    %29 = vector.broadcast %3 : vector<1x64xf32> to vector<16x64xf32>
    %30 = arith.addf %28, %29 : vector<16x64xf32>
    %c0_7 = arith.constant 0 : index
    %c0_8 = arith.constant 0 : index
    %31 = vector.load %arg5[%c0_7, %c0_8] : memref<64x64xf32, #tpu.memory_space<vmem>>, vector<64x64xf32>
    %cst_9 = arith.constant dense<0.000000e+00> : vector<16x64xf32>
    %32 = tpu.matmul %30, %31, %cst_9 {dimension_numbers = #tpu.dot_dimension_numbers<[1], [0], [0], [1], [0, 0, 1, 1], [], []>} : vector<16x64xf32>, vector<64x64xf32>, vector<16x64xf32> -> vector<16x64xf32>
    %c0_10 = arith.constant 0 : index
    %c0_11 = arith.constant 0 : index
    %33 = vector.load %arg6[%c0_10, %c0_11] : memref<64x64xf32, #tpu.memory_space<vmem>>, vector<64x64xf32>
    %c0_12 = arith.constant 0 : index
    %c0_13 = arith.constant 0 : index
    %34 = vector.load %arg7[%c0_12, %c0_13] : memref<64x64xf32, #tpu.memory_space<vmem>>, vector<64x64xf32>
    %c0_14 = arith.constant 0 : index
    %c0_15 = arith.constant 0 : index
    %35 = vector.load %arg8[%c0_14, %c0_15] : memref<64x8xf32, #tpu.memory_space<vmem>>, vector<64x8xf32>
    %c0_16 = arith.constant 0 : index
    %c0_17 = arith.constant 0 : index
    %36 = vector.load %arg10[%c0_16, %c0_17] : memref<8x64xf32, #tpu.memory_space<vmem>>, vector<8x64xf32>
    %c0_18 = arith.constant 0 : index
    %c0_19 = arith.constant 0 : index
    %37 = vector.load %arg9[%c0_18, %c0_19] : memref<1x8xf32, #tpu.memory_space<vmem>>, vector<1x8xf32>
    %c0_20 = arith.constant 0 : index
    %c0_21 = arith.constant 0 : index
    %c0_22 = arith.constant 0 : index
    %38 = vector.load %arg2[%c0_20, %c0_21, %c0_22] : memref<4x16x64xf32, #tpu.memory_space<vmem>>, vector<1x16x64xf32>
    %39 = vector.shape_cast %38 : vector<1x16x64xf32> to vector<16x64xf32>
    %cst_23 = arith.constant dense<0.000000e+00> : vector<16x64xf32>
    %40 = tpu.matmul %39, %33, %cst_23 {dimension_numbers = #tpu.dot_dimension_numbers<[1], [0], [0], [1], [0, 0, 1, 1], [], []>} : vector<16x64xf32>, vector<64x64xf32>, vector<16x64xf32> -> vector<16x64xf32>
    %cst_24 = arith.constant dense<0.000000e+00> : vector<16x64xf32>
    %41 = tpu.matmul %40, %34, %cst_24 {dimension_numbers = #tpu.dot_dimension_numbers<[1], [0], [0], [1], [0, 0, 1, 1], [], []>} : vector<16x64xf32>, vector<64x64xf32>, vector<16x64xf32> -> vector<16x64xf32>
    %c0_25 = arith.constant 0 : index
    %c0_26 = arith.constant 0 : index
    %c0_27 = arith.constant 0 : index
    %42 = vector.load %arg3[%c0_25, %c0_26, %c0_27] : memref<4x16x64xf32, #tpu.memory_space<vmem>>, vector<1x16x64xf32>
    %43 = vector.shape_cast %42 : vector<1x16x64xf32> to vector<16x64xf32>
    %44 = arith.subf %40, %32 : vector<16x64xf32>
    %45 = arith.addf %44, %43 : vector<16x64xf32>
    %cst_28 = arith.constant dense<0.000000e+00> : vector<16x8xf32>
    %46 = tpu.matmul %45, %35, %cst_28 {dimension_numbers = #tpu.dot_dimension_numbers<[1], [0], [0], [1], [0, 0, 1, 1], [], []>} : vector<16x64xf32>, vector<64x8xf32>, vector<16x8xf32> -> vector<16x8xf32>
    %47 = vector.broadcast %37 : vector<1x8xf32> to vector<16x8xf32>
    %48 = arith.addf %46, %47 : vector<16x8xf32>
    %cst_29 = arith.constant 0.000000e+00 : f32
    %49 = vector.broadcast %cst_29 : f32 to vector<16x8xf32>
    %50 = arith.maximumf %48, %49 : vector<16x8xf32>
    %cst_30 = arith.constant dense<0.000000e+00> : vector<16x64xf32>
    %51 = tpu.matmul %50, %36, %cst_30 {dimension_numbers = #tpu.dot_dimension_numbers<[1], [0], [0], [1], [0, 0, 1, 1], [], []>} : vector<16x8xf32>, vector<8x64xf32>, vector<16x64xf32> -> vector<16x64xf32>
    %52 = vector.broadcast %6 : vector<1x64xf32> to vector<16x64xf32>
    %53 = arith.addf %51, %52 : vector<16x64xf32>
    %54 = arith.addf %41, %43 : vector<16x64xf32>
    %c1 = arith.constant 1 : index
    %c0_31 = arith.constant 0 : index
    %c0_32 = arith.constant 0 : index
    %55 = vector.load %arg2[%c1, %c0_31, %c0_32] : memref<4x16x64xf32, #tpu.memory_space<vmem>>, vector<1x16x64xf32>
    %56 = vector.shape_cast %55 : vector<1x16x64xf32> to vector<16x64xf32>
    %cst_33 = arith.constant dense<0.000000e+00> : vector<16x64xf32>
    %57 = tpu.matmul %56, %33, %cst_33 {dimension_numbers = #tpu.dot_dimension_numbers<[1], [0], [0], [1], [0, 0, 1, 1], [], []>} : vector<16x64xf32>, vector<64x64xf32>, vector<16x64xf32> -> vector<16x64xf32>
    %cst_34 = arith.constant dense<0.000000e+00> : vector<16x64xf32>
    %58 = tpu.matmul %57, %34, %cst_34 {dimension_numbers = #tpu.dot_dimension_numbers<[1], [0], [0], [1], [0, 0, 1, 1], [], []>} : vector<16x64xf32>, vector<64x64xf32>, vector<16x64xf32> -> vector<16x64xf32>
    %c1_35 = arith.constant 1 : index
    %c0_36 = arith.constant 0 : index
    %c0_37 = arith.constant 0 : index
    %59 = vector.load %arg3[%c1_35, %c0_36, %c0_37] : memref<4x16x64xf32, #tpu.memory_space<vmem>>, vector<1x16x64xf32>
    %60 = vector.shape_cast %59 : vector<1x16x64xf32> to vector<16x64xf32>
    %61 = arith.subf %57, %32 : vector<16x64xf32>
    %62 = arith.addf %61, %60 : vector<16x64xf32>
    %cst_38 = arith.constant dense<0.000000e+00> : vector<16x8xf32>
    %63 = tpu.matmul %62, %35, %cst_38 {dimension_numbers = #tpu.dot_dimension_numbers<[1], [0], [0], [1], [0, 0, 1, 1], [], []>} : vector<16x64xf32>, vector<64x8xf32>, vector<16x8xf32> -> vector<16x8xf32>
    %64 = vector.broadcast %37 : vector<1x8xf32> to vector<16x8xf32>
    %65 = arith.addf %63, %64 : vector<16x8xf32>
    %cst_39 = arith.constant 0.000000e+00 : f32
    %66 = vector.broadcast %cst_39 : f32 to vector<16x8xf32>
    %67 = arith.maximumf %65, %66 : vector<16x8xf32>
    %cst_40 = arith.constant dense<0.000000e+00> : vector<16x64xf32>
    %68 = tpu.matmul %67, %36, %cst_40 {dimension_numbers = #tpu.dot_dimension_numbers<[1], [0], [0], [1], [0, 0, 1, 1], [], []>} : vector<16x8xf32>, vector<8x64xf32>, vector<16x64xf32> -> vector<16x64xf32>
    %69 = vector.broadcast %6 : vector<1x64xf32> to vector<16x64xf32>
    %70 = arith.addf %68, %69 : vector<16x64xf32>
    %71 = arith.addf %58, %60 : vector<16x64xf32>
    %c2 = arith.constant 2 : index
    %c0_41 = arith.constant 0 : index
    %c0_42 = arith.constant 0 : index
    %72 = vector.load %arg2[%c2, %c0_41, %c0_42] : memref<4x16x64xf32, #tpu.memory_space<vmem>>, vector<1x16x64xf32>
    %73 = vector.shape_cast %72 : vector<1x16x64xf32> to vector<16x64xf32>
    %cst_43 = arith.constant dense<0.000000e+00> : vector<16x64xf32>
    %74 = tpu.matmul %73, %33, %cst_43 {dimension_numbers = #tpu.dot_dimension_numbers<[1], [0], [0], [1], [0, 0, 1, 1], [], []>} : vector<16x64xf32>, vector<64x64xf32>, vector<16x64xf32> -> vector<16x64xf32>
    %cst_44 = arith.constant dense<0.000000e+00> : vector<16x64xf32>
    %75 = tpu.matmul %74, %34, %cst_44 {dimension_numbers = #tpu.dot_dimension_numbers<[1], [0], [0], [1], [0, 0, 1, 1], [], []>} : vector<16x64xf32>, vector<64x64xf32>, vector<16x64xf32> -> vector<16x64xf32>
    %c2_45 = arith.constant 2 : index
    %c0_46 = arith.constant 0 : index
    %c0_47 = arith.constant 0 : index
    %76 = vector.load %arg3[%c2_45, %c0_46, %c0_47] : memref<4x16x64xf32, #tpu.memory_space<vmem>>, vector<1x16x64xf32>
    %77 = vector.shape_cast %76 : vector<1x16x64xf32> to vector<16x64xf32>
    %78 = arith.subf %74, %32 : vector<16x64xf32>
    %79 = arith.addf %78, %77 : vector<16x64xf32>
    %cst_48 = arith.constant dense<0.000000e+00> : vector<16x8xf32>
    %80 = tpu.matmul %79, %35, %cst_48 {dimension_numbers = #tpu.dot_dimension_numbers<[1], [0], [0], [1], [0, 0, 1, 1], [], []>} : vector<16x64xf32>, vector<64x8xf32>, vector<16x8xf32> -> vector<16x8xf32>
    %81 = vector.broadcast %37 : vector<1x8xf32> to vector<16x8xf32>
    %82 = arith.addf %80, %81 : vector<16x8xf32>
    %cst_49 = arith.constant 0.000000e+00 : f32
    %83 = vector.broadcast %cst_49 : f32 to vector<16x8xf32>
    %84 = arith.maximumf %82, %83 : vector<16x8xf32>
    %cst_50 = arith.constant dense<0.000000e+00> : vector<16x64xf32>
    %85 = tpu.matmul %84, %36, %cst_50 {dimension_numbers = #tpu.dot_dimension_numbers<[1], [0], [0], [1], [0, 0, 1, 1], [], []>} : vector<16x8xf32>, vector<8x64xf32>, vector<16x64xf32> -> vector<16x64xf32>
    %86 = vector.broadcast %6 : vector<1x64xf32> to vector<16x64xf32>
    %87 = arith.addf %85, %86 : vector<16x64xf32>
    %88 = arith.addf %75, %77 : vector<16x64xf32>
    %c3 = arith.constant 3 : index
    %c0_51 = arith.constant 0 : index
    %c0_52 = arith.constant 0 : index
    %89 = vector.load %arg2[%c3, %c0_51, %c0_52] : memref<4x16x64xf32, #tpu.memory_space<vmem>>, vector<1x16x64xf32>
    %90 = vector.shape_cast %89 : vector<1x16x64xf32> to vector<16x64xf32>
    %cst_53 = arith.constant dense<0.000000e+00> : vector<16x64xf32>
    %91 = tpu.matmul %90, %33, %cst_53 {dimension_numbers = #tpu.dot_dimension_numbers<[1], [0], [0], [1], [0, 0, 1, 1], [], []>} : vector<16x64xf32>, vector<64x64xf32>, vector<16x64xf32> -> vector<16x64xf32>
    %cst_54 = arith.constant dense<0.000000e+00> : vector<16x64xf32>
    %92 = tpu.matmul %91, %34, %cst_54 {dimension_numbers = #tpu.dot_dimension_numbers<[1], [0], [0], [1], [0, 0, 1, 1], [], []>} : vector<16x64xf32>, vector<64x64xf32>, vector<16x64xf32> -> vector<16x64xf32>
    %c3_55 = arith.constant 3 : index
    %c0_56 = arith.constant 0 : index
    %c0_57 = arith.constant 0 : index
    %93 = vector.load %arg3[%c3_55, %c0_56, %c0_57] : memref<4x16x64xf32, #tpu.memory_space<vmem>>, vector<1x16x64xf32>
    %94 = vector.shape_cast %93 : vector<1x16x64xf32> to vector<16x64xf32>
    %95 = arith.subf %91, %32 : vector<16x64xf32>
    %96 = arith.addf %95, %94 : vector<16x64xf32>
    %cst_58 = arith.constant dense<0.000000e+00> : vector<16x8xf32>
    %97 = tpu.matmul %96, %35, %cst_58 {dimension_numbers = #tpu.dot_dimension_numbers<[1], [0], [0], [1], [0, 0, 1, 1], [], []>} : vector<16x64xf32>, vector<64x8xf32>, vector<16x8xf32> -> vector<16x8xf32>
    %98 = vector.broadcast %37 : vector<1x8xf32> to vector<16x8xf32>
    %99 = arith.addf %97, %98 : vector<16x8xf32>
    %cst_59 = arith.constant 0.000000e+00 : f32
    %100 = vector.broadcast %cst_59 : f32 to vector<16x8xf32>
    %101 = arith.maximumf %99, %100 : vector<16x8xf32>
    %cst_60 = arith.constant dense<0.000000e+00> : vector<16x64xf32>
    %102 = tpu.matmul %101, %36, %cst_60 {dimension_numbers = #tpu.dot_dimension_numbers<[1], [0], [0], [1], [0, 0, 1, 1], [], []>} : vector<16x8xf32>, vector<8x64xf32>, vector<16x64xf32> -> vector<16x64xf32>
    %103 = vector.broadcast %6 : vector<1x64xf32> to vector<16x64xf32>
    %104 = arith.addf %102, %103 : vector<16x64xf32>
    %105 = arith.addf %92, %94 : vector<16x64xf32>
    %106 = arith.maximumf %53, %70 : vector<16x64xf32>
    %107 = arith.maximumf %106, %87 : vector<16x64xf32>
    %108 = arith.maximumf %107, %104 : vector<16x64xf32>
    %109 = arith.subf %53, %108 : vector<16x64xf32>
    %110 = math.exp %109 : vector<16x64xf32>
    %111 = arith.subf %70, %108 : vector<16x64xf32>
    %112 = math.exp %111 : vector<16x64xf32>
    %113 = arith.subf %87, %108 : vector<16x64xf32>
    %114 = math.exp %113 : vector<16x64xf32>
    %115 = arith.subf %104, %108 : vector<16x64xf32>
    %116 = math.exp %115 : vector<16x64xf32>
    %117 = arith.addf %110, %112 : vector<16x64xf32>
    %118 = arith.addf %117, %114 : vector<16x64xf32>
    %119 = arith.addf %118, %116 : vector<16x64xf32>
    %cst_61 = arith.constant 1.000000e+00 : f32
    %120 = vector.broadcast %cst_61 : f32 to vector<16x64xf32>
    %121 = arith.divf %120, %119 : vector<16x64xf32>
    %122 = arith.mulf %110, %54 : vector<16x64xf32>
    %123 = arith.mulf %112, %71 : vector<16x64xf32>
    %124 = arith.addf %122, %123 : vector<16x64xf32>
    %125 = arith.mulf %114, %88 : vector<16x64xf32>
    %126 = arith.addf %124, %125 : vector<16x64xf32>
    %127 = arith.mulf %116, %105 : vector<16x64xf32>
    %128 = arith.addf %126, %127 : vector<16x64xf32>
    %129 = arith.mulf %128, %121 : vector<16x64xf32>
    %c0_62 = arith.constant 0 : index
    %c0_63 = arith.constant 0 : index
    %130 = vector.load %arg11[%c0_62, %c0_63] : memref<64x64xf32, #tpu.memory_space<vmem>>, vector<64x64xf32>
    %cst_64 = arith.constant dense<0.000000e+00> : vector<16x64xf32>
    %131 = tpu.matmul %129, %130, %cst_64 {dimension_numbers = #tpu.dot_dimension_numbers<[1], [0], [0], [1], [0, 0, 1, 1], [], []>} : vector<16x64xf32>, vector<64x64xf32>, vector<16x64xf32> -> vector<16x64xf32>
    %132 = vector.broadcast %7 : vector<1x64xf32> to vector<16x64xf32>
    %133 = arith.addf %131, %132 : vector<16x64xf32>
    %134 = arith.addf %133, %0 : vector<16x64xf32>
    %cst_65 = arith.constant dense<0.000000e+00> : vector<16xf32>
    %135 = vector.multi_reduction <add>, %134, %cst_65 [1] : vector<16x64xf32> to vector<16xf32>
    %136 = vector.shape_cast %135 : vector<16xf32> to vector<16x1xf32>
    %cst_66 = arith.constant 6.400000e+01 : f32
    %137 = vector.broadcast %cst_66 : f32 to vector<16x1xf32>
    %138 = arith.divf %136, %137 : vector<16x1xf32>
    %139 = vector.broadcast %138 : vector<16x1xf32> to vector<16x64xf32>
    %140 = arith.subf %134, %139 : vector<16x64xf32>
    %141 = arith.mulf %140, %140 : vector<16x64xf32>
    %cst_67 = arith.constant dense<0.000000e+00> : vector<16xf32>
    %142 = vector.multi_reduction <add>, %141, %cst_67 [1] : vector<16x64xf32> to vector<16xf32>
    %143 = vector.shape_cast %142 : vector<16xf32> to vector<16x1xf32>
    %cst_68 = arith.constant 6.400000e+01 : f32
    %144 = vector.broadcast %cst_68 : f32 to vector<16x1xf32>
    %145 = arith.divf %143, %144 : vector<16x1xf32>
    %146 = vector.broadcast %138 : vector<16x1xf32> to vector<16x64xf32>
    %147 = arith.subf %134, %146 : vector<16x64xf32>
    %cst_69 = arith.constant 9.99999997E-7 : f32
    %148 = vector.broadcast %cst_69 : f32 to vector<16x1xf32>
    %149 = arith.addf %145, %148 : vector<16x1xf32>
    %150 = math.rsqrt %149 : vector<16x1xf32>
    %151 = vector.broadcast %150 : vector<16x1xf32> to vector<16x64xf32>
    %152 = arith.mulf %147, %151 : vector<16x64xf32>
    %153 = vector.broadcast %4 : vector<1x64xf32> to vector<16x64xf32>
    %154 = arith.mulf %152, %153 : vector<16x64xf32>
    %155 = vector.broadcast %5 : vector<1x64xf32> to vector<16x64xf32>
    %156 = arith.addf %154, %155 : vector<16x64xf32>
    %c0_70 = arith.constant 0 : index
    %c0_71 = arith.constant 0 : index
    %157 = vector.load %arg12[%c0_70, %c0_71] : memref<64x128xf32, #tpu.memory_space<vmem>>, vector<64x128xf32>
    %cst_72 = arith.constant dense<0.000000e+00> : vector<16x128xf32>
    %158 = tpu.matmul %156, %157, %cst_72 {dimension_numbers = #tpu.dot_dimension_numbers<[1], [0], [0], [1], [0, 0, 1, 1], [], []>} : vector<16x64xf32>, vector<64x128xf32>, vector<16x128xf32> -> vector<16x128xf32>
    %c0_73 = arith.constant 0 : index
    %c0_74 = arith.constant 0 : index
    %159 = vector.load %arg13[%c0_73, %c0_74] : memref<1x128xf32, #tpu.memory_space<vmem>>, vector<1x128xf32>
    %160 = vector.broadcast %159 : vector<1x128xf32> to vector<16x128xf32>
    %161 = arith.addf %158, %160 : vector<16x128xf32>
    %cst_75 = arith.constant 0.000000e+00 : f32
    %162 = vector.broadcast %cst_75 : f32 to vector<16x128xf32>
    %163 = arith.maximumf %161, %162 : vector<16x128xf32>
    %c0_76 = arith.constant 0 : index
    %c0_77 = arith.constant 0 : index
    %164 = vector.load %arg14[%c0_76, %c0_77] : memref<128x64xf32, #tpu.memory_space<vmem>>, vector<128x64xf32>
    %cst_78 = arith.constant dense<0.000000e+00> : vector<16x64xf32>
    %165 = tpu.matmul %163, %164, %cst_78 {dimension_numbers = #tpu.dot_dimension_numbers<[1], [0], [0], [1], [0, 0, 1, 1], [], []>} : vector<16x128xf32>, vector<128x64xf32>, vector<16x64xf32> -> vector<16x64xf32>
    %166 = vector.broadcast %8 : vector<1x64xf32> to vector<16x64xf32>
    %167 = arith.addf %165, %166 : vector<16x64xf32>
    %168 = arith.addf %167, %134 : vector<16x64xf32>
    %c0_79 = arith.constant 0 : index
    %c0_80 = arith.constant 0 : index
    %169 = vector.load %arg15[%c0_79, %c0_80] : memref<16x64xf32, #tpu.memory_space<vmem>>, vector<16x64xf32>
    tpu.vector_store %arg15[%c0_79, %c0_80], %168 {strides = array<i32>} : memref<16x64xf32, #tpu.memory_space<vmem>>, vector<16x64xf32>,
    return
  }
  func.func @transform_0(%arg0: i32) -> (i32, i32) {
    %c0_i32 = arith.constant 0 : i32
    %c0_i32_0 = arith.constant 0 : i32
    return %arg0, %c0_i32 : i32, i32
  }
  func.func @transform_1(%arg0: i32) -> (i32, i32, i32) {
    %c0_i32 = arith.constant 0 : i32
    %c0_i32_0 = arith.constant 0 : i32
    %c0_i32_1 = arith.constant 0 : i32
    return %c0_i32, %arg0, %c0_i32_0 : i32, i32, i32
  }
  func.func @transform_2(%arg0: i32) -> (i32, i32, i32) {
    %c0_i32 = arith.constant 0 : i32
    %c0_i32_0 = arith.constant 0 : i32
    %c0_i32_1 = arith.constant 0 : i32
    return %c0_i32, %arg0, %c0_i32_0 : i32, i32, i32
  }
  func.func @transform_3(%arg0: i32) -> (i32, i32) {
    %c0_i32 = arith.constant 0 : i32
    %c0_i32_0 = arith.constant 0 : i32
    %c0_i32_1 = arith.constant 0 : i32
    return %c0_i32, %c0_i32_0 : i32, i32
  }
  func.func @transform_4(%arg0: i32) -> (i32, i32) {
    %c0_i32 = arith.constant 0 : i32
    %c0_i32_0 = arith.constant 0 : i32
    %c0_i32_1 = arith.constant 0 : i32
    return %c0_i32, %c0_i32_0 : i32, i32
  }
  func.func @transform_5(%arg0: i32) -> (i32, i32) {
    %c0_i32 = arith.constant 0 : i32
    %c0_i32_0 = arith.constant 0 : i32
    %c0_i32_1 = arith.constant 0 : i32
    return %c0_i32, %c0_i32_0 : i32, i32
  }
  func.func @transform_6(%arg0: i32) -> (i32, i32) {
    %c0_i32 = arith.constant 0 : i32
    %c0_i32_0 = arith.constant 0 : i32
    %c0_i32_1 = arith.constant 0 : i32
    return %c0_i32, %c0_i32_0 : i32, i32
  }
  func.func @transform_7(%arg0: i32) -> (i32, i32) {
    %c0_i32 = arith.constant 0 : i32
    %c0_i32_0 = arith.constant 0 : i32
    %c0_i32_1 = arith.constant 0 : i32
    return %c0_i32, %c0_i32_0 : i32, i32
  }
  func.func @transform_8(%arg0: i32) -> (i32, i32) {
    %c0_i32 = arith.constant 0 : i32
    %c0_i32_0 = arith.constant 0 : i32
    %c0_i32_1 = arith.constant 0 : i32
    return %c0_i32, %c0_i32_0 : i32, i32
  }
  func.func @transform_9(%arg0: i32) -> (i32, i32) {
    %c0_i32 = arith.constant 0 : i32
    %c0_i32_0 = arith.constant 0 : i32
    %c0_i32_1 = arith.constant 0 : i32
    return %c0_i32, %c0_i32_0 : i32, i32
  }
  func.func @transform_10(%arg0: i32) -> (i32, i32) {
    %c0_i32 = arith.constant 0 : i32
    %c0_i32_0 = arith.constant 0 : i32
    %c0_i32_1 = arith.constant 0 : i32
    return %c0_i32, %c0_i32_0 : i32, i32
  }
  func.func @transform_11(%arg0: i32) -> (i32, i32) {
    %c0_i32 = arith.constant 0 : i32
    %c0_i32_0 = arith.constant 0 : i32
    %c0_i32_1 = arith.constant 0 : i32
    return %c0_i32, %c0_i32_0 : i32, i32
  }
  func.func @transform_12(%arg0: i32) -> (i32, i32) {
    %c0_i32 = arith.constant 0 : i32
    %c0_i32_0 = arith.constant 0 : i32
    %c0_i32_1 = arith.constant 0 : i32
    return %c0_i32, %c0_i32_0 : i32, i32
  }
  func.func @transform_13(%arg0: i32) -> (i32, i32) {
    %c0_i32 = arith.constant 0 : i32
    %c0_i32_0 = arith.constant 0 : i32
    %c0_i32_1 = arith.constant 0 : i32
    return %c0_i32, %c0_i32_0 : i32, i32
  }
  func.func @transform_14(%arg0: i32) -> (i32, i32) {
    %c0_i32 = arith.constant 0 : i32
    %c0_i32_0 = arith.constant 0 : i32
    return %arg0, %c0_i32 : i32, i32
  }
}

</mosaic_0001>

<bundles_post_ra>
// kernel: tpu_custom_call.1
= control target key start
LH: loop header
LB: loop body
LE: loop exit
PB: predicated region body
PF: predicated region fallthrough
CT: control target
= control target key end

     0   :  { %19 = vsyncpa [#allocation3], 0  ;;  %s1878_s0 = inlined_call_operand.vmem [shape: f32[16,64], index: 0, kind: input, shape index: {}]   ;;  %s1879_s1 = inlined_call_operand.vmem [shape: f32[4,16,64], index: 1, kind: input, shape index: {}]   ;;  %s1880_s2 = inlined_call_operand.vmem [shape: f32[4,16,64], index: 2, kind: input, shape index: {}]   ;;  %s1881_s3 = inlined_call_operand.hbm [shape: f32[8,64], index: 3, kind: input, shape index: {}]   ;;  %s1882_s4 = inlined_call_operand.vmem [shape: f32[64,64], index: 4, kind: input, shape index: {}]   ;;  %s1883_s5 = inlined_call_operand.hbm [shape: f32[64,64], index: 5, kind: input, shape index: {}]   ;;  %s1884_s6 = inlined_call_operand.hbm [shape: f32[64,64], index: 6, kind: input, shape index: {}]   ;;  %s1885_s7 = inlined_call_operand.vmem [shape: f32[64,8], index: 7, kind: input, shape index: {}]   ;;  %s1886_s8 = inlined_call_operand.vmem [shape: f32[1,8], index: 8, kind: input, shape index: {}]   ;;  %s1887_s9 = inlined_call_operand.hbm [shape: f32[8,64], index: 9, kind: input, shape index: {}]   ;;  %s1888_s10 = inlined_call_operand.hbm [shape: f32[64,64], index: 10, kind: input, shape index: {}]   ;;  %s1889_s11 = inlined_call_operand.hbm [shape: f32[64,128], index: 11, kind: input, shape index: {}]   ;;  %s1890_s12 = inlined_call_operand.vmem [shape: f32[1,128], index: 12, kind: input, shape index: {}]   ;;  %s1891_s13 = inlined_call_operand.vmem [shape: f32[128,64], index: 13, kind: input, shape index: {}]   ;;  %s1892_s14 = inlined_call_operand.hbm [shape: f32[16,64], index: 14, kind: output, shape index: {}]  }
   0x1   :  { %20 = vsyncpa [#allocation6], 0 }
   0x2   :  { %21 = vsyncpa [#allocation9], 0 }
   0x3   :  { %22 = vsyncpa [#allocation12], 0  ;;  %s47_s15 = sshll.u32 %s1883_s5, 4  ;;  %s48_s15 = int_to_ptr.hbm [resolvable:$true] %s47_s15 }
   0x4   :  { %23 = vsyncpa [#allocation4], 0  ;;  %s1328_s16 = smov [#allocation5]   ;;  %s78_s20 = sshll.u32 %s1887_s9, 4  ;;  %s79_s20 = int_to_ptr.hbm [resolvable:$true] %s78_s20 }
   0x5   :  { %s49_s17 = sshll.u32 %s1328_s16, 4  ;;  %s1329_s21 = smov 128   ;;  %s50_s17 = int_to_ptr.vmem [resolvable:$true] %s49_s17 }
   0x6   :  { %s1330_s22 = smov 8   ;;  %s1331_s23 = smov [#allocation8]  }
   0x7   :  { %55 = dma.hbm_to_vmem [thread:$0]  %s48_s15, 1024, %s50_s17, [#allocation6], %s1329_s21, %s1329_s21, %s1330_s22  }
   0x8   :  { %s80_s24 = sshll.u32 %s1331_s23, 4  ;;  %s35_s26 = sshll.u32 %s1881_s3, 4  ;;  %s81_s24 = int_to_ptr.vmem [resolvable:$true] %s80_s24  ;;  %s36_s26 = int_to_ptr.hbm [resolvable:$true] %s35_s26 }
   0x9   :  { %83 = dma.hbm_to_vmem [thread:$0]  %s79_s20, 128, %s81_s24, [#allocation9]  }
   0xa   :  { %s60_s9 = sshll.u32 %s1884_s6, 4  ;;  %s1332_s29 = smov [#allocation2]   ;;  %s61_s9 = int_to_ptr.hbm [resolvable:$true] %s60_s9 }
   0xb   :  { %s37_s30 = sshll.u32 %s1332_s29, 4  ;;  %s1333_s15 = smov [#allocation7]   ;;  %s38_s30 = int_to_ptr.vmem [resolvable:$true] %s37_s30 }
   0xc   :  { %40 = dma.hbm_to_vmem [thread:$0]  %s36_s26, 128, %s38_s30, [#allocation3]  }
   0xd   :  { %s62_s16 = sshll.u32 %s1333_s15, 4  ;;  %s88_s19 = sshll.u32 %s1888_s10, 4  ;;  %s63_s16 = int_to_ptr.vmem [resolvable:$true] %s62_s16  ;;  %s89_s19 = int_to_ptr.hbm [resolvable:$true] %s88_s19 }
   0xe   :  { %68 = dma.hbm_to_vmem [thread:$0]  %s61_s9, 1024, %s63_s16, [#allocation6], %s1329_s21, %s1329_s21, %s1330_s22  }
   0xf   :  { %s101_s6 = sshll.u32 %s1889_s11, 4  ;;  %s1334_s23 = smov [#allocation10]   ;;  %s102_s6 = int_to_ptr.hbm [resolvable:$true] %s101_s6 }
  0x10   :  { %s90_s24 = sshll.u32 %s1334_s23, 4  ;;  %s1335_s25 = smov [#allocation11]   ;;  %s91_s24 = int_to_ptr.vmem [resolvable:$true] %s90_s24 }
  0x11   :  { %96 = dma.hbm_to_vmem [thread:$0]  %s89_s19, 1024, %s91_s24, [#allocation9], %s1329_s21, %s1329_s21, %s1330_s22  }
  0x12   :  { %s103_s10 = sshll.u32 %s1335_s25, 4  ;;  %s104_s10 = int_to_ptr.vmem [resolvable:$true] %s103_s10 }
  0x13   :  { %109 = dma.hbm_to_vmem [thread:$0]  %s102_s6, 1024, %s104_s10, [#allocation12], %s1329_s21, %s1329_s21, %s1330_s22  }
  0x14   :  { %1318 = dma.done.wait [#allocation3], 128  }
  0x15   :  { %1319 = vsyncadd [#allocation3], 4294967168 }
  0x16   :  { %1320 = dma.done.wait [#allocation6], 2048  }
  0x17   :  { %1321 = vsyncadd [#allocation6], 4294965248 }
  0x18   :  { %1322 = dma.done.wait [#allocation9], 1152  }
  0x19   :  { %1323 = vsyncadd [#allocation9], 4294966144 }
  0x1a   :  { %1324 = dma.done.wait [#allocation12], 1024  }
  0x1b   :  { %1325 = vsyncadd [#allocation12], 4294966272  ;;  %vm141_vm0 = vcmask 523264   ;;  %v1446_v0 = vld [vmem:[%s1878_s0] sm:$0xff]  ;;  %v1453_v2 = vld [vmem:[%s1878_s0 + $0x8] sm:$0xff]  ;;  %v1336_v4 = vmov 64.0  }
  0x1c   :  { %v142_v1 = vsel %vm141_vm0, %v1446_v0, 0.0  ;;  %v145_v3 = vsel %vm141_vm0, %v1453_v2, 0.0  ;;  %1120 = vrcp.f32 %v1336_v4  ;;  %v206_v21 = vld [vmem:[%s1882_s4 + $0x38] sm:$0xff]  ;;  %v1476_v22 = vld [vmem:[#allocation5 + $0x38] sm:$0xff]  ;;  %v205_v23 = vld [vmem:[%s1882_s4 + $0x30] sm:$0xff]  ;;  %vm334_vm8 = vcmask 64512  }
  0x1d   :  { %143 = vadd.xlane.f32.xlu0 %v142_v1  ;;  %221 = vmatpush.msra.mxu0 %v206_v21  ;;  %v1482_v24 = vld [vmem:[#allocation5 + $0x30] sm:$0xff]  ;;  %v204_v25 = vld [vmem:[%s1882_s4 + $0x28] sm:$0xff]  ;;  %v1488_v26 = vld [vmem:[#allocation5 + $0x28] sm:$0xff] }
  0x1e   :  { %278 = vmatpush.msra.mxu1 %v1476_v22  ;;  %v203_v27 = vld [vmem:[%s1882_s4 + $0x20] sm:$0xff]  ;;  %v1494_v28 = vld [vmem:[#allocation5 + $0x20] sm:$0xff]  ;;  %v202_v29 = vld [vmem:[%s1882_s4 + $0x18] sm:$0xff] }
  0x1f   :  { %222 = vmatpush.msra.mxu0 %v205_v23  ;;  %v1500_v30 = vld [vmem:[#allocation5 + $0x18] sm:$0xff]  ;;  %v201_v31 = vld [vmem:[%s1882_s4 + $0x10] sm:$0xff]  ;;  %v1506_v32 = vld [vmem:[#allocation5 + $0x10] sm:$0xff] }
  0x20   :  { %279 = vmatpush.msra.mxu1 %v1482_v24  ;;  %v200_v33 = vld [vmem:[%s1882_s4 + $0x8] sm:$0xff]  ;;  %v1512_v34 = vld [vmem:[#allocation5 + $0x8] sm:$0xff]  ;;  %v199_v35 = vld [vmem:[%s1882_s4] sm:$0xff] }
  0x21   :  { %223 = vmatpush.msra.mxu0 %v204_v25  ;;  %v1518_v36 = vld [vmem:[#allocation5] sm:$0xff]  ;;  %v262_v37 = vld [vmem:[%s1879_s1] sm:$0xff] }
  0x22   :  { %v1121_v5 = vpop.eup %1120  ;;  %280 = vmatpush.msra.mxu1 %v1488_v26  ;;  %v263_v41 = vld [vmem:[%s1879_s1 + $0x8] sm:$0xff]  ;;  %v1539_v50 = vld [vmem:[#allocation2] sm:$0xff] }
  0x23   :  { %v149_v6 = vmul.f32 64.0, %v1121_v5  ;;  %vm153_vm1 = vweird.f32 %v1121_v5  ;;  %224 = vmatpush.msra.mxu0 %v203_v27  ;;  %v193_v54 = vperm.slane %v1539_v50, 0  ;;  %v196_v58 = vperm.slane %v1539_v50, 1  ;;  %v1616_v23 = vld [vmem:[%s1880_s2] sm:$0xff] }
  0x24   :  { %281 = vmatpush.msra.mxu1 %v1494_v28 }
  0x25   :  { %146 = vadd.xlane.f32.xlu0 %v145_v3  ;;  %v150_v7 = vsub.f32 1.0, %v149_v6  ;;  %225 = vmatpush.msra.mxu0 %v202_v29  ;;  %v1068_v6 = vld [vmem:[%s1879_s1 + $0x10] sm:$0xff] }
  0x26   :  { %282 = vmatpush.msra.mxu1 %v1500_v30 }
  0x27   :  { %v151_v8 = vmul.f32 %v1121_v5, %v150_v7  ;;  %226 = vmatpush.msra.mxu0 %v201_v31  ;;  %v1069_v7 = vld [vmem:[%s1879_s1 + $0x18] sm:$0xff] }
  0x28   :  { %283 = vmatpush.msra.mxu1 %v1506_v32 }
  0x29   :  { %v152_v9 = vadd.f32 %v1121_v5, %v151_v8  ;;  %227 = vmatpush.msra.mxu0 %v200_v33  ;;  %v259_v8 = vld [vmem:[%s1885_s7 + $0x38] sm:$0xff] }
  0x2a   :  { %284 = vmatpush.msra.mxu1 %v1512_v34  ;;  %316 = vmatpush.msra.mxu2 %v259_v8 }
  0x2b   :  { %v1457_v10 = vsel %vm153_vm1, %v1121_v5, %v152_v9  ;;  %228 = vmatpush.msra.mxu0 %v199_v35  ;;  %v258_v9 = vld [vmem:[%s1885_s7 + $0x30] sm:$0xff] }
  0x2c   :  { %285 = vmatpush.msra.mxu1 %v1518_v36  ;;  %317 = vmatpush.msra.mxu2 %v258_v9 }
  0x2d   :  { %1060 = vmatmul.msk.f32.vlgmr.msra.gmra.mxu1 %vm141_vm0, %v262_v37  ;;  %410 = vmatpush.msrb.mxu0 %v1476_v22 }
  0x2e   :  { %446 = vmatpush.msrb.mxu1 %v259_v8 }
  0x2f   :  { %411 = vmatpush.msrb.mxu0 %v1482_v24 }
  0x30   :  { %447 = vmatpush.msrb.mxu1 %v258_v9 }
  0x31   :  { %412 = vmatpush.msrb.mxu0 %v1488_v26 }
  0x33   :  { %413 = vmatpush.msrb.mxu0 %v1494_v28 }
  0x35   :  { %1061 = vmatmul.msk.f32.gmra.mxu1 %vm141_vm0, %v263_v41  ;;  %414 = vmatpush.msrb.mxu0 %v1500_v30 }
  0x37   :  { %415 = vmatpush.msrb.mxu0 %v1506_v32 }
  0x39   :  { %416 = vmatpush.msrb.mxu0 %v1512_v34 }
  0x3b   :  { %417 = vmatpush.msrb.mxu0 %v1518_v36 }
  0x90   :  { %v144_v11 = vpop.xlane.xlu0 %143 }
  0x91   :  { %v155_v12 = vmul.f32 %v1457_v10, %v144_v11  ;;  %v257_v11 = vld [vmem:[%s1885_s7 + $0x28] sm:$0xff] }
  0x92   :  { %318 = vmatpush.msra.mxu2 %v257_v11  ;;  %448 = vmatpush.msrb.mxu1 %v257_v11 }
  0x93   :  { %v1461_v13 = vsub.f32 %v1446_v0, %v155_v12  ;;  %v256_v12 = vld [vmem:[%s1885_s7 + $0x20] sm:$0xff] }
  0x94   :  { %319 = vmatpush.msra.mxu2 %v256_v12  ;;  %449 = vmatpush.msrb.mxu1 %v256_v12 }
  0x95   :  { %v159_v14 = vmul.f32 %v1461_v13, %v1461_v13 }
  0x97   :  { %v161_v15 = vsel %vm141_vm0, %v159_v14, 0.0  ;;  %v255_v14 = vld [vmem:[%s1885_s7 + $0x18] sm:$0xff] }
  0x98   :  { %162 = vadd.xlane.f32.xlu1 %v161_v15  ;;  %v147_v16 = vpop.xlane.xlu0 %146  ;;  %320 = vmatpush.msra.mxu2 %v255_v14  ;;  %v1081_v15 = vld [vmem:[%s1879_s1 + $0x28] sm:$0xff] }
  0x99   :  { %v156_v17 = vmul.f32 %v1457_v10, %v147_v16  ;;  %450 = vmatpush.msrb.mxu1 %v255_v14  ;;  %v1092_v16 = vld [vmem:[%s1879_s1 + $0x30] sm:$0xff] }
  0x9b   :  { %v1468_v18 = vsub.f32 %v1453_v2, %v156_v17  ;;  %v1093_v17 = vld [vmem:[%s1879_s1 + $0x38] sm:$0xff] }
  0x9d   :  { %v160_v19 = vmul.f32 %v1468_v18, %v1468_v18 }
  0x9f   :  { %v164_v20 = vsel %vm141_vm0, %v160_v19, 0.0  ;;  %v253_v19 = vld [vmem:[%s1885_s7 + $0x8] sm:$0xff] }
  0xa0   :  { %165 = vadd.xlane.f32.xlu1 %v164_v20  ;;  %v252_v20 = vld [vmem:[%s1885_s7] sm:$0xff] }
  0xaa   :  { %v1611_v21 = vpop.f32.mrf.mxu1 }
 0x10b   :  { %v163_v38 = vpop.xlane.xlu1 %162 }
 0x10c   :  { %v167_v39 = vmul.f32 %v163_v38, %v1457_v10 }
 0x10e   :  { %v169_v40 = vadd.f32 1e-06, %v167_v39 }
 0x110   :  { %1122 = vrsqrt.f32 %v169_v40  ;;  %vm177_vm3 = vweird.f32 %v169_v40 }
 0x113   :  { %v166_v42 = vpop.xlane.xlu1 %165 }
 0x114   :  { %v168_v43 = vmul.f32 %v166_v42, %v1457_v10 }
 0x116   :  { %v1123_v44 = vpop.eup %1122  ;;  %v170_v45 = vadd.f32 1e-06, %v168_v43 }
 0x117   :  { %v172_v46 = vmul.f32 %v1123_v44, %v169_v40  ;;  %vm178_vm2 = vweird.f32 %v1123_v44  ;;  %v1656_v40 = vld [vmem:[%s1880_s2 + $0x20] sm:$0xff] }
 0x118   :  { %1124 = vrsqrt.f32 %v170_v45  ;;  %vm179_vm4 = vmor %vm177_vm3, %vm178_vm2  ;;  %vm187_vm6 = vweird.f32 %v170_v45 }
 0x119   :  { %v173_v47 = vmul.f32 %v1123_v44, %v172_v46 }
 0x11b   :  { %v174_v48 = vmul.f32 0.5, %v173_v47 }
 0x11d   :  { %v175_v49 = vsub.f32 1.5, %v174_v48  ;;  %v1676_v48 = vld [vmem:[%s1880_s2 + $0x30] sm:$0xff] }
 0x11e   :  { %v1125_v51 = vpop.eup %1124 }
 0x11f   :  { %v176_v52 = vmul.f32 %v1123_v44, %v175_v49  ;;  %v182_v53 = vmul.f32 %v1125_v51, %v170_v45  ;;  %vm188_vm5 = vweird.f32 %v1125_v51 }
 0x120   :  { %vm189_vm7 = vmor %vm187_vm6, %vm188_vm5 }
 0x121   :  { %v180_v55 = vsel %vm179_vm4, %v1123_v44, %v176_v52  ;;  %v183_v56 = vmul.f32 %v1125_v51, %v182_v53  ;;  %v1666_v44 = vld [vmem:[%s1880_s2 + $0x28] sm:$0xff]  ;;  %v1686_v53 = vld [vmem:[%s1880_s2 + $0x38] sm:$0xff] }
 0x122   :  { %v191_v57 = vmul.f32 %v180_v55, %v1461_v13  ;;  %v1080_v13 = vld [vmem:[%s1879_s1 + $0x20] sm:$0xff] }
 0x123   :  { %v184_v59 = vmul.f32 0.5, %v183_v56  ;;  %v260_v56 = vld [vmem:[#allocation8] sm:$0xff] }
 0x124   :  { %v194_v60 = vmul.f32 %v193_v54, %v191_v57  ;;  %356 = vmatpush.msra.mxu3 %v260_v56  ;;  %v1691_v57 = vld [vmem:[#allocation7 + $0x38] sm:$0xff] }
 0x125   :  { %v185_v61 = vsub.f32 1.5, %v184_v59  ;;  %v1697_v59 = vld [vmem:[#allocation7 + $0x28] sm:$0xff] }
 0x126   :  { %v197_v62 = vadd.f32 %v196_v58, %v194_v60  ;;  %378 = vmatpush.msrb.mxu3 %v1691_v57  ;;  %v1700_v60 = vld [vmem:[#allocation7 + $0x20] sm:$0xff] }
 0x127   :  { %v186_v63 = vmul.f32 %v1125_v51, %v185_v61  ;;  %v1703_v61 = vld [vmem:[#allocation7 + $0x18] sm:$0xff] }
 0x128   :  { %1058 = vmatmul.msk.f32.vlgmr.msra.gmra.mxu0 %vm141_vm0, %v197_v62  ;;  %v1705_v62 = vld [vmem:[#allocation7 + $0x10] sm:$0xff] }
 0x129   :  { %v190_v1 = vsel %vm189_vm7, %v1125_v51, %v186_v63  ;;  %538 = vmatpush.msra.mxu0 %v1476_v22  ;;  %v1708_v63 = vld [vmem:[#allocation7 + $0x8] sm:$0xff] }
 0x12a   :  { %v192_v3 = vmul.f32 %v190_v1, %v1468_v18  ;;  %v254_v18 = vld [vmem:[%s1885_s7 + $0x10] sm:$0xff]  ;;  %v1712_v1 = vld [vmem:[#allocation7] sm:$0xff]  ;;  %s1042_s7 = sshll.u32 %s1892_s14, 4  ;;  %s1043_s7 = int_to_ptr.hbm [resolvable:$true] %s1042_s7 }
 0x12b   :  { %539 = vmatpush.msra.mxu0 %v1482_v24  ;;  %321 = vmatpush.msra.mxu2 %v254_v18 }
 0x12c   :  { %v195_v4 = vmul.f32 %v193_v54, %v192_v3  ;;  %451 = vmatpush.msrb.mxu1 %v254_v18  ;;  %v1118_v3 = vld [vmem:[%s1886_s8] ss:$0 sm:$0xff] }
 0x12d   :  { %540 = vmatpush.msra.mxu0 %v1488_v26  ;;  %322 = vmatpush.msra.mxu2 %v253_v19 }
 0x12e   :  { %v198_v5 = vadd.f32 %v196_v58, %v195_v4  ;;  %452 = vmatpush.msrb.mxu1 %v253_v19  ;;  %v1693_v58 = vld [vmem:[#allocation7 + $0x30] sm:$0xff] }
 0x12f   :  { %541 = vmatpush.msra.mxu0 %v1494_v28  ;;  %323 = vmatpush.msra.mxu2 %v252_v20 }
 0x130   :  { %1059 = vmatmul.msk.f32.gmra.mxu0 %vm141_vm0, %v198_v5  ;;  %453 = vmatpush.msrb.mxu1 %v252_v20 }
 0x131   :  { %542 = vmatpush.msra.mxu0 %v1500_v30  ;;  %612 = vmatpush.msrb.mxu2 %v260_v56 }
 0x132   :  { %574 = vmatpush.msra.mxu1 %v259_v8  ;;  %379 = vmatpush.msrb.mxu3 %v1693_v58 }
 0x133   :  { %543 = vmatpush.msra.mxu0 %v1506_v32 }
 0x134   :  { %575 = vmatpush.msra.mxu1 %v258_v9  ;;  %380 = vmatpush.msrb.mxu3 %v1697_v59 }
 0x135   :  { %544 = vmatpush.msra.mxu0 %v1512_v34 }
 0x136   :  { %576 = vmatpush.msra.mxu1 %v257_v11  ;;  %381 = vmatpush.msrb.mxu3 %v1700_v60 }
 0x137   :  { %545 = vmatpush.msra.mxu0 %v1518_v36 }
 0x138   :  { %1070 = vmatmul.msk.f32.vlgmr.msrb.gmra.mxu0 %vm141_vm0, %v1068_v6  ;;  %577 = vmatpush.msra.mxu1 %v256_v12 }
 0x139   :  { %666 = vmatpush.msrb.mxu0 %v1476_v22  ;;  %382 = vmatpush.msrb.mxu3 %v1703_v61 }
 0x13a   :  { %578 = vmatpush.msra.mxu1 %v255_v14 }
 0x13b   :  { %667 = vmatpush.msrb.mxu0 %v1482_v24  ;;  %383 = vmatpush.msrb.mxu3 %v1705_v62 }
 0x13c   :  { %579 = vmatpush.msra.mxu1 %v254_v18 }
 0x13d   :  { %668 = vmatpush.msrb.mxu0 %v1488_v26  ;;  %v1621_v26 = vpop.f32.mrf.mxu1  ;;  %384 = vmatpush.msrb.mxu3 %v1708_v63 }
 0x13e   :  { %580 = vmatpush.msra.mxu1 %v253_v19 }
 0x13f   :  { %669 = vmatpush.msrb.mxu0 %v1494_v28  ;;  %v1626_v28 = vld [vmem:[%s1880_s2 + $0x8] sm:$0xff]  ;;  %385 = vmatpush.msrb.mxu3 %v1712_v1 }
 0x140   :  { %1071 = vmatmul.msk.f32.gmra.mxu0 %vm141_vm0, %v1069_v7  ;;  %581 = vmatpush.msra.mxu1 %v252_v20 }
 0x141   :  { %670 = vmatpush.msrb.mxu0 %v1500_v30 }
 0x143   :  { %671 = vmatpush.msrb.mxu0 %v1506_v32  ;;  %v1636_v32 = vld [vmem:[%s1880_s2 + $0x10] sm:$0xff] }
 0x145   :  { %672 = vmatpush.msrb.mxu0 %v1512_v34 }
 0x147   :  { %673 = vmatpush.msrb.mxu0 %v1518_v36  ;;  %v1646_v36 = vld [vmem:[%s1880_s2 + $0x18] sm:$0xff] }
 0x148   :  { %1082 = vmatmul.msk.f32.vlgmr.msra.gmra.mxu0 %vm141_vm0, %v1080_v13 }
 0x150   :  { %1083 = vmatmul.msk.f32.gmra.mxu0 %vm141_vm0, %v1081_v15 }
 0x158   :  { %1094 = vmatmul.msk.f32.vlgmr.msrb.gmra.mxu0 %vm141_vm0, %v1092_v16 }
 0x160   :  { %1095 = vmatmul.msk.f32.gmra.mxu0 %vm141_vm0, %v1093_v17 }
 0x1a5   :  { %v230_v22 = vpop.f32.mrf.mxu0 }
 0x1a6   :  { %v295_v24 = vsub.f32 %v1611_v21, %v230_v22 }
 0x1a8   :  { %v297_v25 = vadd.f32 %v295_v24, %v1616_v23 }
 0x1aa   :  { %1062 = vmatmul.msk.f32.vlgmr.msra.gmra.mxu2 %vm141_vm0, %v297_v25 }
 0x1ab   :  { %740 = vmatpush.msra.mxu2 %v260_v56 }
 0x1ad   :  { %v233_v27 = vpop.f32.mrf.mxu0 }
 0x1ae   :  { %v296_v29 = vsub.f32 %v1621_v26, %v233_v27 }
 0x1b0   :  { %v298_v30 = vadd.f32 %v296_v29, %v1626_v28 }
 0x1b2   :  { %1063 = vmatmul.msk.f32.gmra.mxu2 %vm141_vm0, %v298_v30 }
 0x1b5   :  { %v1631_v31 = vpop.f32.mrf.mxu0 }
 0x1b6   :  { %v428_v33 = vsub.f32 %v1631_v31, %v230_v22 }
 0x1b8   :  { %v430_v34 = vadd.f32 %v1636_v32, %v428_v33 }
 0x1ba   :  { %1074 = vmatmul.msk.f32.vlgmr.msrb.gmra.mxu1 %vm141_vm0, %v430_v34 }
 0x1bb   :  { %702 = vmatpush.msrb.mxu1 %v259_v8 }
 0x1bd   :  { %v1641_v35 = vpop.f32.mrf.mxu0  ;;  %703 = vmatpush.msrb.mxu1 %v258_v9 }
 0x1be   :  { %v429_v37 = vsub.f32 %v1641_v35, %v233_v27 }
 0x1bf   :  { %704 = vmatpush.msrb.mxu1 %v257_v11 }
 0x1c0   :  { %v431_v38 = vadd.f32 %v1646_v36, %v429_v37 }
 0x1c1   :  { %705 = vmatpush.msrb.mxu1 %v256_v12 }
 0x1c2   :  { %1075 = vmatmul.msk.f32.gmra.mxu1 %vm141_vm0, %v431_v38 }
 0x1c3   :  { %706 = vmatpush.msrb.mxu1 %v255_v14 }
 0x1c5   :  { %v1651_v39 = vpop.f32.mrf.mxu0  ;;  %707 = vmatpush.msrb.mxu1 %v254_v18 }
 0x1c6   :  { %v556_v41 = vsub.f32 %v1651_v39, %v230_v22 }
 0x1c7   :  { %708 = vmatpush.msrb.mxu1 %v253_v19 }
 0x1c8   :  { %v558_v42 = vadd.f32 %v1656_v40, %v556_v41  ;;  %v333_v41 = vperm.slane %v1539_v50, 4 }
 0x1c9   :  { %709 = vmatpush.msrb.mxu1 %v252_v20 }
 0x1ca   :  { %1086 = vmatmul.msk.f32.vlgmr.msra.gmra.mxu1 %vm141_vm0, %v558_v42 }
 0x1cd   :  { %v1661_v43 = vpop.f32.mrf.mxu0 }
 0x1ce   :  { %v557_v45 = vsub.f32 %v1661_v43, %v233_v27 }
 0x1d0   :  { %v559_v46 = vadd.f32 %v1666_v44, %v557_v45 }
 0x1d2   :  { %1087 = vmatmul.msk.f32.gmra.mxu1 %vm141_vm0, %v559_v46 }
 0x1d5   :  { %v1671_v47 = vpop.f32.mrf.mxu0 }
 0x1d6   :  { %v684_v49 = vsub.f32 %v1671_v47, %v230_v22 }
 0x1d8   :  { %v686_v51 = vadd.f32 %v1676_v48, %v684_v49 }
 0x1da   :  { %1098 = vmatmul.msk.f32.vlgmr.msrb.gmra.mxu1 %vm141_vm0, %v686_v51 }
 0x1dd   :  { %v1681_v52 = vpop.f32.mrf.mxu0 }
 0x1de   :  { %v685_v54 = vsub.f32 %v1681_v52, %v233_v27 }
 0x1e0   :  { %v687_v55 = vadd.f32 %v1686_v53, %v685_v54 }
 0x1e2   :  { %1099 = vmatmul.msk.f32.gmra.mxu1 %vm141_vm0, %v687_v55  ;;  %v866_v55 = vld [vmem:[#allocation10 + $0x38] sm:$0xff] }
 0x1e3   :  { %882 = vmatpush.msra.mxu0 %v866_v55 }
 0x22d   :  { %v325_v4 = vpop.f32.mrf.mxu2 }
 0x22e   :  { %v326_v5 = vadd.f32 %v1118_v3, %v325_v4 }
 0x230   :  { %v331_v6 = vmax.f32 %v326_v5, 0.0 }
 0x232   :  { %1064 = vmatmul.msk.f32.vlgmr.msra.gmra.mxu3 %vm334_vm8, %v331_v6 }
 0x233   :  { %484 = vmatpush.msra.mxu3 %v260_v56 }
 0x235   :  { %v328_v7 = vpop.f32.mrf.mxu2 }
 0x236   :  { %v329_v8 = vadd.f32 %v1118_v3, %v328_v7 }
 0x237   :  { %v455_v9 = vpop.f32.mrf.mxu1 }
 0x238   :  { %v332_v11 = vmax.f32 %v329_v8, 0.0  ;;  %v456_v16 = vadd.f32 %v1118_v3, %v455_v9 }
 0x23a   :  { %1065 = vmatmul.msk.f32.gmra.mxu3 %vm334_vm8, %v332_v11  ;;  %v461_v18 = vmax.f32 %v456_v16, 0.0  ;;  %v861_v16 = vld [vmem:[#allocation10 + $0x10] sm:$0xff] }
 0x23f   :  { %v458_v12 = vpop.f32.mrf.mxu1 }
 0x242   :  { %1066 = vmatmul.msk.f32.vlgmr.msrb.gmra.mxu3 %vm141_vm0, %v1611_v21  ;;  %v459_v21 = vadd.f32 %v1118_v3, %v458_v12 }
 0x243   :  { %506 = vmatpush.msrb.mxu3 %v1691_v57 }
 0x244   :  { %v462_v24 = vmax.f32 %v459_v21, 0.0 }
 0x245   :  { %507 = vmatpush.msrb.mxu3 %v1693_v58 }
 0x247   :  { %v583_v13 = vpop.f32.mrf.mxu1  ;;  %508 = vmatpush.msrb.mxu3 %v1697_v59 }
 0x248   :  { %v584_v14 = vadd.f32 %v1118_v3, %v583_v13  ;;  %v862_v13 = vld [vmem:[#allocation10 + $0x18] sm:$0xff] }
 0x249   :  { %509 = vmatpush.msrb.mxu3 %v1700_v60 }
 0x24a   :  { %v589_v15 = vmax.f32 %v584_v14, 0.0  ;;  %1067 = vmatmul.msk.f32.gmra.mxu3 %vm141_vm0, %v1621_v26 }
 0x24b   :  { %510 = vmatpush.msrb.mxu3 %v1703_v61 }
 0x24c   :  { %1088 = vmatmul.msk.f32.vlgmr.msrb.gmra.mxu2 %vm334_vm8, %v589_v15 }
 0x24d   :  { %511 = vmatpush.msrb.mxu3 %v1705_v62 }
 0x24f   :  { %v586_v17 = vpop.f32.mrf.mxu1  ;;  %512 = vmatpush.msrb.mxu3 %v1708_v63 }
 0x250   :  { %v587_v19 = vadd.f32 %v1118_v3, %v586_v17 }
 0x251   :  { %513 = vmatpush.msrb.mxu3 %v1712_v1 }
 0x252   :  { %v590_v20 = vmax.f32 %v587_v19, 0.0  ;;  %1076 = vmatmul.msk.f32.vlgmr.msra.gmra.mxu3 %vm334_vm8, %v461_v18 }
 0x253   :  { %634 = vmatpush.msra.mxu3 %v1691_v57 }
 0x254   :  { %1089 = vmatmul.msk.f32.gmra.mxu2 %vm334_vm8, %v590_v20  ;;  %v860_v20 = vld [vmem:[#allocation10 + $0x8] sm:$0xff] }
 0x255   :  { %635 = vmatpush.msra.mxu3 %v1693_v58 }
 0x257   :  { %v711_v22 = vpop.f32.mrf.mxu1  ;;  %636 = vmatpush.msra.mxu3 %v1697_v59 }
 0x258   :  { %v712_v25 = vadd.f32 %v1118_v3, %v711_v22  ;;  %v859_v22 = vld [vmem:[#allocation10] sm:$0xff] }
 0x259   :  { %637 = vmatpush.msra.mxu3 %v1700_v60 }
 0x25a   :  { %v717_v26 = vmax.f32 %v712_v25, 0.0  ;;  %1077 = vmatmul.msk.f32.gmra.mxu3 %vm334_vm8, %v462_v24 }
 0x25b   :  { %638 = vmatpush.msra.mxu3 %v1703_v61 }
 0x25c   :  { %1100 = vmatmul.msk.f32.vlgmr.msra.gmra.mxu2 %vm334_vm8, %v717_v26 }
 0x25d   :  { %639 = vmatpush.msra.mxu3 %v1705_v62 }
 0x25f   :  { %v714_v27 = vpop.f32.mrf.mxu1  ;;  %640 = vmatpush.msra.mxu3 %v1708_v63 }
 0x260   :  { %v715_v29 = vadd.f32 %v1118_v3, %v714_v27  ;;  %v863_v3 = vld [vmem:[#allocation10 + $0x20] sm:$0xff] }
 0x261   :  { %641 = vmatpush.msra.mxu3 %v1712_v1 }
 0x262   :  { %v718_v30 = vmax.f32 %v715_v29, 0.0  ;;  %1078 = vmatmul.msk.f32.vlgmr.msrb.gmra.mxu3 %vm141_vm0, %v1631_v31 }
 0x263   :  { %762 = vmatpush.msrb.mxu3 %v1691_v57 }
 0x264   :  { %1101 = vmatmul.msk.f32.gmra.mxu2 %vm334_vm8, %v718_v30 }
 0x265   :  { %763 = vmatpush.msrb.mxu3 %v1693_v58  ;;  %v865_v58 = vld [vmem:[#allocation10 + $0x30] sm:$0xff] }
 0x266   :  { %883 = vmatpush.msra.mxu0 %v865_v58 }
 0x267   :  { %764 = vmatpush.msrb.mxu3 %v1697_v59  ;;  %v864_v59 = vld [vmem:[#allocation10 + $0x28] sm:$0xff] }
 0x268   :  { %884 = vmatpush.msra.mxu0 %v864_v59 }
 0x269   :  { %765 = vmatpush.msrb.mxu3 %v1700_v60 }
 0x26a   :  { %1079 = vmatmul.msk.f32.gmra.mxu3 %vm141_vm0, %v1641_v35  ;;  %885 = vmatpush.msra.mxu0 %v863_v3 }
 0x26b   :  { %766 = vmatpush.msrb.mxu3 %v1703_v61 }
 0x26c   :  { %886 = vmatpush.msra.mxu0 %v862_v13 }
 0x26d   :  { %767 = vmatpush.msrb.mxu3 %v1705_v62 }
 0x26e   :  { %887 = vmatpush.msra.mxu0 %v861_v16 }
 0x26f   :  { %768 = vmatpush.msrb.mxu3 %v1708_v63 }
 0x270   :  { %888 = vmatpush.msra.mxu0 %v860_v20 }
 0x271   :  { %769 = vmatpush.msrb.mxu3 %v1712_v1 }
 0x272   :  { %1090 = vmatmul.msk.f32.vlgmr.msra.gmra.mxu3 %vm141_vm0, %v1651_v39  ;;  %889 = vmatpush.msra.mxu0 %v859_v22 }
 0x27a   :  { %1091 = vmatmul.msk.f32.gmra.mxu3 %vm141_vm0, %v1661_v43 }
 0x282   :  { %1102 = vmatmul.msk.f32.vlgmr.msrb.gmra.mxu3 %vm141_vm0, %v1671_v47 }
 0x28a   :  { %1103 = vmatmul.msk.f32.gmra.mxu3 %vm141_vm0, %v1681_v52 }
 0x2b5   :  { %v358_v31 = vpop.f32.mrf.mxu3 }
 0x2b6   :  { %v359_v45 = vadd.f32 %v358_v31, %v333_v41 }
 0x2bd   :  { %v361_v33 = vpop.f32.mrf.mxu3 }
 0x2be   :  { %v362_v56 = vadd.f32 %v361_v33, %v333_v41 }
 0x2c5   :  { %v1766_v34 = vpop.f32.mrf.mxu3 }
 0x2cd   :  { %v1768_v35 = vpop.f32.mrf.mxu3 }
 0x2cf   :  { %v614_v37 = vpop.f32.mrf.mxu2 }
 0x2d0   :  { %v615_v49 = vadd.f32 %v614_v37, %v333_v41 }
 0x2d5   :  { %v486_v38 = vpop.f32.mrf.mxu3 }
 0x2d6   :  { %v487_v42 = vadd.f32 %v486_v38, %v333_v41 }
 0x2d7   :  { %v617_v39 = vpop.f32.mrf.mxu2 }
 0x2d8   :  { %v777_v43 = vmax.f32 %v359_v45, %v487_v42  ;;  %v618_v4 = vadd.f32 %v617_v39, %v333_v41 }
 0x2da   :  { %v779_v52 = vmax.f32 %v777_v43, %v615_v49 }
 0x2dd   :  { %v489_v46 = vpop.f32.mrf.mxu3 }
 0x2de   :  { %v490_v51 = vadd.f32 %v489_v46, %v333_v41 }
 0x2df   :  { %v742_v47 = vpop.f32.mrf.mxu2 }
 0x2e0   :  { %v743_v54 = vadd.f32 %v742_v47, %v333_v41  ;;  %v778_v60 = vmax.f32 %v362_v56, %v490_v51 }
 0x2e2   :  { %v781_v57 = vmax.f32 %v779_v52, %v743_v54  ;;  %v780_v11 = vmax.f32 %v778_v60, %v618_v4 }
 0x2e4   :  { %v783_v61 = vsub.f32 %v359_v45, %v781_v57  ;;  %v789_v62 = vsub.f32 %v487_v42, %v781_v57  ;;  %v795_v63 = vsub.f32 %v615_v49, %v781_v57  ;;  %v801_v6 = vsub.f32 %v743_v54, %v781_v57 }
 0x2e5   :  { %v515_v1 = vpop.f32.mrf.mxu3  ;;  %v388_v57 = vadd.f32 %v1766_v34, %v1616_v23 }
 0x2e6   :  { %v785_v5 = vmul.f32 1.442695, %v783_v61  ;;  %v791_v7 = vmul.f32 1.442695, %v789_v62  ;;  %v797_v12 = vmul.f32 1.442695, %v795_v63  ;;  %v516_v58 = vadd.f32 %v1636_v32, %v515_v1 }
 0x2e7   :  { %v745_v8 = vpop.f32.mrf.mxu2  ;;  %v803_v14 = vmul.f32 1.442695, %v801_v6  ;;  %v391_v32 = vadd.f32 %v1768_v35, %v1626_v28 }
 0x2e8   :  { %1126 = vpow2.f32 %v785_v5  ;;  %v746_v9 = vadd.f32 %v745_v8, %v333_v41 }
 0x2e9   :  { %1128 = vpow2.f32 %v791_v7 }
 0x2ea   :  { %v782_v15 = vmax.f32 %v780_v11, %v746_v9  ;;  %1130 = vpow2.f32 %v797_v12 }
 0x2eb   :  { %1132 = vpow2.f32 %v803_v14 }
 0x2ec   :  { %v784_v17 = vsub.f32 %v362_v56, %v782_v15  ;;  %v790_v18 = vsub.f32 %v490_v51, %v782_v15  ;;  %v796_v19 = vsub.f32 %v618_v4, %v782_v15  ;;  %v802_v26 = vsub.f32 %v746_v9, %v782_v15 }
 0x2ed   :  { %v518_v21 = vpop.f32.mrf.mxu3 }
 0x2ee   :  { %v1127_v24 = vpop.eup %1126  ;;  %v787_v25 = vmul.f32 1.442695, %v784_v17  ;;  %v793_v27 = vmul.f32 1.442695, %v790_v18  ;;  %v799_v30 = vmul.f32 1.442695, %v796_v19 }
 0x2ef   :  { %v1129_v29 = vpop.eup %1128  ;;  %v805_v37 = vmul.f32 1.442695, %v802_v26  ;;  %v843_v61 = vmul.f32 %v1127_v24, %v388_v57 }
 0x2f0   :  { %1134 = vpow2.f32 %v787_v25  ;;  %v807_v31 = vadd.f32 %v1129_v29, %v1127_v24  ;;  %v1131_v33 = vpop.eup %1130  ;;  %v845_v62 = vmul.f32 %v1129_v29, %v516_v58  ;;  %v956_v58 = vld [vmem:[#allocation11 + $0x38] sm:$0xff] }
 0x2f1   :  { %1136 = vpow2.f32 %v793_v27  ;;  %v1133_v41 = vpop.eup %1132  ;;  %975 = vmatpush.msra.mxu1 %v956_v58 }
 0x2f2   :  { %v809_v38 = vadd.f32 %v1131_v33, %v807_v31  ;;  %1138 = vpow2.f32 %v799_v30  ;;  %v847_v6 = vadd.f32 %v845_v62, %v843_v61  ;;  %v953_v61 = vld [vmem:[#allocation11 + $0x20] sm:$0xff]  ;;  %v952_v62 = vld [vmem:[#allocation11 + $0x18] sm:$0xff] }
 0x2f3   :  { %1140 = vpow2.f32 %v805_v37  ;;  %v867_v37 = vperm.slane %v1539_v50, 5 }
 0x2f4   :  { %v811_v42 = vadd.f32 %v1133_v41, %v809_v38 }
 0x2f5   :  { %v643_v39 = vpop.f32.mrf.mxu3 }
 0x2f6   :  { %v1135_v45 = vpop.eup %1134  ;;  %1142 = vrcp.f32 %v811_v42  ;;  %v644_v59 = vadd.f32 %v1656_v40, %v643_v39  ;;  %v824_v8 = vand.u32 2147483648, %v811_v42  ;;  %vm818_vm10 = vweird.f32 %v811_v42 }
 0x2f7   :  { %v1137_v43 = vpop.eup %1136  ;;  %v822_v23 = vand.u32 2147483647, %v811_v42  ;;  %v519_v40 = vadd.f32 %v1646_v36, %v518_v21  ;;  %v844_v15 = vmul.f32 %v1135_v45, %v391_v32 }
 0x2f8   :  { %v808_v46 = vadd.f32 %v1137_v43, %v1135_v45  ;;  %v1139_v49 = vpop.eup %1138  ;;  %v849_v3 = vmul.f32 %v1131_v33, %v644_v59  ;;  %v825_v16 = vor.u32 1.1754944e-38, %v824_v8  ;;  %v955_v59 = vld [vmem:[#allocation11 + $0x30] sm:$0xff]  ;;  %v1007_v8 = vld [vmem:[%s1891_s13 + $0x78] sm:$0xff] }
 0x2f9   :  { %v1141_v51 = vpop.eup %1140  ;;  %v846_v17 = vmul.f32 %v1137_v43, %v519_v40  ;;  %vm823_vm12 = vcmp.eq.f32.partialorder %v822_v23, 8.507059e+37  ;;  %976 = vmatpush.msra.mxu1 %v955_v59  ;;  %1009 = vmatpush.msrb.mxu2 %v1007_v8  ;;  %v1005_v23 = vld [vmem:[%s1891_s13 + $0x68] sm:$0xff]  ;;  %v1004_v40 = vld [vmem:[%s1891_s13 + $0x60] sm:$0xff] }
 0x2fa   :  { %v810_v47 = vadd.f32 %v1139_v49, %v808_v46  ;;  %v851_v1 = vadd.f32 %v849_v3, %v847_v6  ;;  %v950_v3 = vld [vmem:[#allocation11 + $0x8] sm:$0xff] }
 0x2fb   :  { %v848_v35 = vadd.f32 %v846_v17, %v844_v15  ;;  %v1000_v17 = vld [vmem:[%s1891_s13 + $0x40] sm:$0xff] }
 0x2fc   :  { %v1143_v54 = vpop.eup %1142  ;;  %v812_v55 = vadd.f32 %v1141_v51, %v810_v47 }
 0x2fd   :  { %v646_v52 = vpop.f32.mrf.mxu3  ;;  %v814_v56 = vmul.f32 %v1143_v54, %v811_v42  ;;  %vm819_vm9 = vweird.f32 %v1143_v54 }
 0x2fe   :  { %1144 = vrcp.f32 %v812_v55  ;;  %vm820_vm11 = vmor %vm818_vm10, %vm819_vm9  ;;  %v647_v11 = vadd.f32 %v1666_v44, %v646_v52  ;;  %v839_v36 = vand.u32 2147483648, %v812_v55  ;;  %vm833_vm14 = vweird.f32 %v812_v55 }
 0x2ff   :  { %v815_v60 = vsub.f32 1.0, %v814_v56  ;;  %v837_v44 = vand.u32 2147483647, %v812_v55 }
 0x300   :  { %v850_v20 = vmul.f32 %v1139_v49, %v647_v11  ;;  %v840_v29 = vor.u32 1.1754944e-38, %v839_v36 }
 0x301   :  { %v816_v63 = vmul.f32 %v1143_v54, %v815_v60  ;;  %vm838_vm1 = vcmp.eq.f32.partialorder %v837_v44, 8.507059e+37  ;;  %v954_v60 = vld [vmem:[#allocation11 + $0x28] sm:$0xff]  ;;  %v946_v44 = vperm.slane %v1539_v50, 3 }
 0x302   :  { %v852_v25 = vadd.f32 %v850_v20, %v848_v35  ;;  %977 = vmatpush.msra.mxu1 %v954_v60 }
 0x303   :  { %v817_v4 = vadd.f32 %v1143_v54, %v816_v63  ;;  %v951_v63 = vld [vmem:[#allocation11 + $0x10] sm:$0xff] }
 0x304   :  { %v1145_v5 = vpop.eup %1144  ;;  %978 = vmatpush.msra.mxu1 %v953_v61 }
 0x305   :  { %v771_v7 = vpop.f32.mrf.mxu3  ;;  %v829_v34 = vmul.f32 %v1145_v5, %v812_v55  ;;  %v821_v12 = vsel %vm820_vm11, %v1143_v54, %v817_v4  ;;  %vm834_vm13 = vweird.f32 %v1145_v5  ;;  %v949_v4 = vld [vmem:[#allocation11] sm:$0xff] }
 0x306   :  { %v772_v9 = vadd.f32 %v1676_v48, %v771_v7  ;;  %v826_v19 = vsel %vm823_vm12, %v825_v16, %v821_v12  ;;  %vm835_vm15 = vmor %vm833_vm14, %vm834_vm13  ;;  %979 = vmatpush.msra.mxu1 %v952_v62  ;;  %v1003_v12 = vld [vmem:[%s1891_s13 + $0x58] sm:$0xff] }
 0x307   :  { %v830_v14 = vsub.f32 1.0, %v829_v34 }
 0x308   :  { %v853_v13 = vmul.f32 %v1133_v41, %v772_v9  ;;  %980 = vmatpush.msra.mxu1 %v951_v63  ;;  %v1006_v9 = vld [vmem:[%s1891_s13 + $0x70] sm:$0xff] }
 0x309   :  { %v831_v18 = vmul.f32 %v1145_v5, %v830_v14  ;;  %1010 = vmatpush.msrb.mxu2 %v1006_v9  ;;  %v1002_v14 = vld [vmem:[%s1891_s13 + $0x50] sm:$0xff] }
 0x30a   :  { %v855_v48 = vadd.f32 %v853_v13, %v851_v1  ;;  %981 = vmatpush.msra.mxu1 %v950_v3 }
 0x30b   :  { %v832_v24 = vadd.f32 %v1145_v5, %v831_v18  ;;  %1011 = vmatpush.msrb.mxu2 %v1005_v23 }
 0x30c   :  { %v857_v22 = vmul.f32 %v855_v48, %v826_v19  ;;  %982 = vmatpush.msra.mxu1 %v949_v4  ;;  %v999_v19 = vld [vmem:[%s1891_s13 + $0x38] sm:$0xff] }
 0x30d   :  { %v774_v28 = vpop.f32.mrf.mxu3  ;;  %v836_v27 = vsel %vm835_vm15, %v1145_v5, %v832_v24  ;;  %1012 = vmatpush.msrb.mxu2 %v1004_v40  ;;  %v943_v24 = vperm.slane %v1539_v50, 2 }
 0x30e   :  { %v775_v21 = vadd.f32 %v1686_v53, %v774_v28  ;;  %1104 = vmatmul.msk.f32.vlgmr.msra.gmra.mxu0 %vm141_vm0, %v857_v22  ;;  %v841_v31 = vsel %vm838_vm1, %v840_v29, %v836_v27  ;;  %v998_v28 = vld [vmem:[%s1891_s13 + $0x30] sm:$0xff]  ;;  %v996_v29 = vld [vmem:[%s1891_s13 + $0x20] sm:$0xff] }
 0x30f   :  { %1013 = vmatpush.msrb.mxu2 %v1003_v12 }
 0x310   :  { %v854_v26 = vmul.f32 %v1141_v51, %v775_v21 }
 0x311   :  { %1014 = vmatpush.msrb.mxu2 %v1002_v14 }
 0x312   :  { %v856_v30 = vadd.f32 %v854_v26, %v852_v25  ;;  %v997_v25 = vld [vmem:[%s1891_s13 + $0x28] sm:$0xff] }
 0x314   :  { %v858_v33 = vmul.f32 %v856_v30, %v841_v31 }
 0x316   :  { %1105 = vmatmul.msk.f32.gmra.mxu0 %vm141_vm0, %v858_v33  ;;  %v995_v33 = vld [vmem:[%s1891_s13 + $0x18] sm:$0xff] }
 0x38b   :  { %v891_v38 = vpop.f32.mrf.mxu0 }
 0x38c   :  { %v892_v41 = vadd.f32 %v891_v38, %v867_v37 }
 0x38e   :  { %v1785_v53 = vadd.f32 %v892_v41, %v1446_v0 }
 0x390   :  { %v899_v39 = vsel %vm141_vm0, %v1785_v53, 0.0 }
 0x391   :  { %900 = vadd.xlane.f32.xlu2 %v899_v39 }
 0x393   :  { %v894_v42 = vpop.f32.mrf.mxu0 }
 0x394   :  { %v895_v45 = vadd.f32 %v894_v42, %v867_v37 }
 0x396   :  { %v1790_v43 = vadd.f32 %v895_v45, %v1453_v2  ;;  %v994_v45 = vld [vmem:[%s1891_s13 + $0x10] sm:$0xff] }
 0x398   :  { %v902_v46 = vsel %vm141_vm0, %v1790_v43, 0.0 }
 0x399   :  { %903 = vadd.xlane.f32.xlu2 %v902_v46  ;;  %v993_v46 = vld [vmem:[%s1891_s13 + $0x8] sm:$0xff] }
 0x404   :  { %v901_v49 = vpop.xlane.xlu2 %900 }
 0x405   :  { %v905_v47 = vmul.f32 %v901_v49, %v1457_v10  ;;  %v992_v49 = vld [vmem:[%s1891_s13] sm:$0xff] }
 0x407   :  { %v1796_v51 = vsub.f32 %v1785_v53, %v905_v47  ;;  %v1119_v47 = vld [vmem:[%s1890_s12] ss:$0 sm:$0xff] }
 0x409   :  { %v909_v0 = vmul.f32 %v1796_v51, %v1796_v51 }
 0x40b   :  { %v911_v54 = vsel %vm141_vm0, %v909_v0, 0.0 }
 0x40c   :  { %912 = vadd.xlane.f32.xlu0 %v911_v54  ;;  %v904_v52 = vpop.xlane.xlu2 %903 }
 0x40d   :  { %v906_v2 = vmul.f32 %v904_v52, %v1457_v10 }
 0x40f   :  { %v1803_v55 = vsub.f32 %v1790_v43, %v906_v2 }
 0x411   :  { %v910_v56 = vmul.f32 %v1803_v55, %v1803_v55 }
 0x413   :  { %v914_v57 = vsel %vm141_vm0, %v910_v56, 0.0  ;;  %v1008_v56 = vperm.slane %v1539_v50, 6 }
 0x414   :  { %915 = vadd.xlane.f32.xlu1 %v914_v57 }
 0x47f   :  { %v913_v5 = vpop.xlane.xlu0 %912 }
 0x480   :  { %v917_v6 = vmul.f32 %v913_v5, %v1457_v10 }
 0x482   :  { %v919_v7 = vadd.f32 1e-06, %v917_v6 }
 0x484   :  { %1146 = vrsqrt.f32 %v919_v7  ;;  %vm927_vm3 = vweird.f32 %v919_v7 }
 0x487   :  { %v916_v34 = vpop.xlane.xlu1 %915 }
 0x488   :  { %v918_v32 = vmul.f32 %v916_v34, %v1457_v10  ;;  %v1001_v10 = vld [vmem:[%s1891_s13 + $0x48] sm:$0xff]  ;;  %s1337_s13 = smov [#allocation13]  }
 0x489   :  { %1015 = vmatpush.msrb.mxu2 %v1001_v10  ;;  %s1040_s1 = sshll.u32 %s1337_s13, 4  ;;  %s1041_s1 = int_to_ptr.vmem [resolvable:$true] %s1040_s1 }
 0x48a   :  { %v1147_v1 = vpop.eup %1146  ;;  %v920_v11 = vadd.f32 1e-06, %v918_v32 }
 0x48b   :  { %v922_v13 = vmul.f32 %v1147_v1, %v919_v7  ;;  %vm928_vm2 = vweird.f32 %v1147_v1  ;;  %1016 = vmatpush.msrb.mxu2 %v1000_v17 }
 0x48c   :  { %1148 = vrsqrt.f32 %v920_v11  ;;  %vm929_vm4 = vmor %vm927_vm3, %vm928_vm2  ;;  %vm937_vm6 = vweird.f32 %v920_v11 }
 0x48d   :  { %v923_v15 = vmul.f32 %v1147_v1, %v922_v13  ;;  %1017 = vmatpush.msrb.mxu2 %v999_v19 }
 0x48f   :  { %v924_v16 = vmul.f32 0.5, %v923_v15  ;;  %1018 = vmatpush.msrb.mxu2 %v998_v28 }
 0x491   :  { %v925_v48 = vsub.f32 1.5, %v924_v16  ;;  %1019 = vmatpush.msrb.mxu2 %v997_v25 }
 0x492   :  { %v1149_v18 = vpop.eup %1148 }
 0x493   :  { %v926_v20 = vmul.f32 %v1147_v1, %v925_v48  ;;  %v932_v22 = vmul.f32 %v1149_v18, %v920_v11  ;;  %vm938_vm5 = vweird.f32 %v1149_v18  ;;  %1020 = vmatpush.msrb.mxu2 %v996_v29 }
 0x494   :  { %vm939_vm7 = vmor %vm937_vm6, %vm938_vm5 }
 0x495   :  { %v930_v36 = vsel %vm929_vm4, %v1147_v1, %v926_v20  ;;  %v933_v35 = vmul.f32 %v1149_v18, %v932_v22  ;;  %1021 = vmatpush.msrb.mxu2 %v995_v33 }
 0x496   :  { %v941_v21 = vmul.f32 %v930_v36, %v1796_v51 }
 0x497   :  { %v934_v26 = vmul.f32 0.5, %v933_v35  ;;  %1022 = vmatpush.msrb.mxu2 %v994_v45 }
 0x498   :  { %v944_v27 = vmul.f32 %v943_v24, %v941_v21 }
 0x499   :  { %v935_v30 = vsub.f32 1.5, %v934_v26  ;;  %1023 = vmatpush.msrb.mxu2 %v993_v46 }
 0x49a   :  { %v947_v31 = vadd.f32 %v946_v44, %v944_v27 }
 0x49b   :  { %v936_v37 = vmul.f32 %v1149_v18, %v935_v30  ;;  %1024 = vmatpush.msrb.mxu2 %v992_v49 }
 0x49c   :  { %1106 = vmatmul.msk.f32.vlgmr.msra.gmra.mxu1 %vm141_vm0, %v947_v31 }
 0x49d   :  { %v940_v38 = vsel %vm939_vm7, %v1149_v18, %v936_v37 }
 0x49e   :  { %v942_v41 = vmul.f32 %v940_v38, %v1803_v55 }
 0x4a0   :  { %v945_v39 = vmul.f32 %v943_v24, %v942_v41 }
 0x4a2   :  { %v948_v42 = vadd.f32 %v946_v44, %v945_v39 }
 0x4a4   :  { %1107 = vmatmul.msk.f32.gmra.mxu1 %vm141_vm0, %v948_v42 }
 0x519   :  { %v984_v51 = vpop.f32.mrf.mxu1 }
 0x51a   :  { %v985_v0 = vadd.f32 %v1119_v47, %v984_v51 }
 0x51c   :  { %v990_v54 = vmax.f32 %v985_v0, 0.0 }
 0x51e   :  { %1025 = vmatmul.f32.vlgmr.msrb.gmra.mxu2 %v990_v54 }
 0x521   :  { %v987_v52 = vpop.f32.mrf.mxu1 }
 0x522   :  { %v988_v2 = vadd.f32 %v1119_v47, %v987_v52 }
 0x524   :  { %v991_v55 = vmax.f32 %v988_v2, 0.0 }
 0x526   :  { %1028 = vmatmul.f32.gmra.mxu2 %v991_v55 }
 0x5a1   :  { %v1026_v57 = vpop.f32.mrf.mxu2 }
 0x5a2   :  { %v1027_v58 = vadd.f32 %v1026_v57, %v1008_v56 }
 0x5a4   :  { %v1032_v59 = vadd.f32 %v1027_v58, %v1785_v53 }
 0x5a6   :  { %1034 = vst.msk [vmem:[#allocation13] sm:$0xff] %vm141_vm0, %v1032_v59 }
 0x5a9   :  { %v1029_v60 = vpop.f32.mrf.mxu2 }
 0x5aa   :  { %v1030_v61 = vadd.f32 %v1029_v60, %v1008_v56 }
 0x5ac   :  { %v1033_v62 = vadd.f32 %v1030_v61, %v1790_v43 }
 0x5ae   :  { %1035 = vst.msk [vmem:[#allocation13 + $0x8] sm:$0xff] %vm141_vm0, %v1033_v62 }
 0x5af   :  { %1048 = dma.vmem_to_hbm [thread:$0]  %s1041_s1, 256, %s1043_s7, [#allocation4], %s1329_s21, %s1329_s21, %s1330_s22  }
 0x5b0   :  { %1326 = dma.done.wait [#allocation4], 256  }
 0x5b1   :  { %1327 = vsyncadd [#allocation4], 4294967040 }
 0x5b2   :  { %1053 = vsyncpa [#allocation3], 1 }
 0x5b3   :  { %1054 = vsyncpa [#allocation6], 1 }
 0x5b4   :  { %1055 = vsyncpa [#allocation9], 1 }
 0x5b5   :  { %1056 = vsyncpa [#allocation12], 1 }
 0x5b6   :  { %1057 = vsyncpa [#allocation4], 1 }

</bundles_post_ra>
